<compile_context>
chip_gen: v7x
topology: tpu7x:2x2x1
jax: 0.10.0
libtpu: 0.0.40
codegen_flags: <defaults>
</compile_context>

<pallas_src>
import numpy as np

import jax
import jax.numpy as jnp
from jax.experimental import pallas as pl
from jax.experimental.pallas import tpu as pltpu

BN_EPS = 1e-5
MXU_DTYPE = jnp.bfloat16          # MXU operand dtype (f32 accumulation)
VMEM_LIMIT = 32 * 1024 * 1024     # explicit scoped-VMEM limit (v7x-safe)


def _round_up(x, m):
    return (x + m - 1) // m * m


def _compiler_params():
    return pltpu.CompilerParams(
        dimension_semantics=("parallel",),
        vmem_limit_bytes=VMEM_LIMIT,
    )


# ----------------------------------------------------------------------------
# Conv layer kernel:  [apply previous layer's BN+ReLU]  ->  3x3 conv (per-tile
# im2col via pltpu.roll + one bf16 MXU matmul)  ->  per-block BN partial sums.
# Activations live in a (N, C, S_pad) layout: per image, the (H+2)x(W+2)
# zero-bordered map is flattened row-major and lane-padded to S_pad (mult. of
# 128), so every load/store/matmul operand is lane-dense.
# ----------------------------------------------------------------------------
def _make_conv_kernel(apply_prev, emit_applied, S_pad, Wp):
    assert apply_prev or not emit_applied
    deltas = tuple((kh - 1) * Wp + (kw - 1) for kh in range(3) for kw in range(3))

    def kernel(*refs):
        i = 0
        mask_ref = refs[i]; i += 1          # (1, S_pad) f32, 1 at valid pixels
        x_ref = refs[i]; i += 1             # (1, Cin, S_pad) f32
        w_ref = refs[i]; i += 1             # (Cout, 9*Cin) bf16
        if apply_prev:
            a_ref = refs[i]; i += 1         # (Cin, 1) f32
            b_ref = refs[i]; i += 1         # (Cin, 1) f32
        y_ref = refs[i]; i += 1             # (1, Cout, S_pad) f32
        stats_ref = refs[i]; i += 1         # (1, Cout, 2) f32
        if emit_applied:
            xapp_ref = refs[i]; i += 1      # (1, Cin, S_pad) f32

        maskf = mask_ref[...]               # (1, S_pad)
        x = x_ref[0]                        # (Cin, S_pad)
        if apply_prev:
            # Fused BN affine + ReLU of the previous layer; the mask multiply
            # re-zeroes the border/pad so x is a valid zero-padded conv input.
            x = jnp.maximum(x * a_ref[...] + b_ref[...], 0.0) * maskf
            if emit_applied:
                xapp_ref[0] = x

        # Per-tile im2col: the 9 taps are XLU rolls of the flat zero-bordered
        # map (no wrap at interior positions), concatenated along K.
        taps = []
        for d in deltas:
            taps.append(x if d == 0 else pltpu.roll(x, shift=(-d) % S_pad, axis=1))
        patches = jnp.concatenate(taps, axis=0).astype(MXU_DTYPE)   # (9*Cin, S_pad)

        # Single MXU matmul, bf16 operands, f32 accumulation.
        y = jnp.dot(w_ref[...], patches, preferred_element_type=jnp.float32)
        y_ref[0] = y

        # Per-block BN partial statistics over valid (interior) positions.
        ym = y * maskf
        stats_ref[0] = jnp.concatenate(
            [jnp.sum(ym, axis=1, keepdims=True),
             jnp.sum(ym * ym, axis=1, keepdims=True)], axis=1)

    return kernel


def _conv_layer_call(x, w, mask, a_prev, b_prev, *, apply_prev, emit_applied,
                     Wp, S_pad):
    N, cin, _ = x.shape
    cout = w.shape[0]
    kernel = _make_conv_kernel(apply_prev, emit_applied, S_pad, Wp)

    inputs = [mask, x, w]
    in_specs = [
        pl.BlockSpec((1, S_pad), lambda n: (0, 0)),
        pl.BlockSpec((1, cin, S_pad), lambda n: (n, 0, 0)),
        pl.BlockSpec((cout, 9 * cin), lambda n: (0, 0)),
    ]
    if apply_prev:
        inputs += [a_prev, b_prev]
        in_specs += [pl.BlockSpec((cin, 1), lambda n: (0, 0)),
                     pl.BlockSpec((cin, 1), lambda n: (0, 0))]

    out_shape = [jax.ShapeDtypeStruct((N, cout, S_pad), jnp.float32),
                 jax.ShapeDtypeStruct((N, cout, 2), jnp.float32)]
    out_specs = [pl.BlockSpec((1, cout, S_pad), lambda n: (n, 0, 0)),
                 pl.BlockSpec((1, cout, 2), lambda n: (n, 0, 0))]
    if emit_applied:
        out_shape.append(jax.ShapeDtypeStruct((N, cin, S_pad), jnp.float32))
        out_specs.append(pl.BlockSpec((1, cin, S_pad), lambda n: (n, 0, 0)))

    return pl.pallas_call(
        kernel,
        out_shape=tuple(out_shape),
        grid=(N,),
        in_specs=in_specs,
        out_specs=tuple(out_specs),
        compiler_params=_compiler_params(),
    )(*inputs)


def _bn_finalize(stats, gamma, beta, count):
    """Tiny XLA finalize of the per-block partial sums -> fused BN affine."""
    s = jnp.sum(stats[:, :, 0], axis=0)
    q = jnp.sum(stats[:, :, 1], axis=0)
    mean = s / count
    var = jnp.maximum(q / count - mean * mean, 0.0)   # biased var (PyTorch train)
    a = gamma * jax.lax.rsqrt(var + BN_EPS)
    b = beta - mean * a
    return a[:, None], b[:, None]


# ----------------------------------------------------------------------------
# Pool kernel: applies the down-conv's BN+ReLU to the four 2x2 window
# candidates (quarter-resolution, lane-dense at realistic sizes) and emits
# only quarter-res max + PyTorch argmax plus the activated candidate pieces.
# ----------------------------------------------------------------------------
def _make_pool_kernel(width):
    offs = (0, 1, width, width + 1)     # PyTorch flat-index offsets of the window

    def kernel(base_ref, c00, c01, c10, c11, a_ref, b_ref,
               d00, d01, d10, d11, pmax_ref, pidx_ref):
        a = a_ref[...]
        b = b_ref[...]
        base = base_ref[...]                            # (1, Q) i32 top-left idx
        c_refs = (c00, c01, c10, c11)
        d_refs = (d00, d01, d10, d11)

        acts = []
        for k in range(4):
            act = jnp.maximum(c_refs[k][0] * a + b, 0.0)  # (F, Q) f32
            d_refs[k][0] = act                            # down pieces (reused)
            acts.append(act)

        m = acts[0]
        mi = jnp.broadcast_to(base + offs[0], m.shape)
        for k in range(1, 4):
            take = acts[k] > m                            # strict >: first max wins
            mi = jnp.where(take, base + offs[k], mi)
            m = jnp.where(take, acts[k], m)
        pmax_ref[0] = m
        pidx_ref[0] = mi

    return kernel


def _pool_call(cands, base, a, b, *, width):
    N, F, Q = cands[0].shape
    kernel = _make_pool_kernel(width)
    spec_q = pl.BlockSpec((1, F, Q), lambda n: (n, 0, 0))
    in_specs = ([pl.BlockSpec((1, Q), lambda n: (0, 0))]
                + [spec_q] * 4
                + [pl.BlockSpec((F, 1), lambda n: (0, 0)),
                   pl.BlockSpec((F, 1), lambda n: (0, 0))])
    out_shape = tuple([jax.ShapeDtypeStruct((N, F, Q), jnp.float32)] * 5
                      + [jax.ShapeDtypeStruct((N, F, Q), jnp.int32)])
    out_specs = (spec_q,) * 6
    return pl.pallas_call(
        kernel,
        out_shape=out_shape,
        grid=(N,),
        in_specs=in_specs,
        out_specs=out_specs,
        compiler_params=_compiler_params(),
    )(base, *cands, a, b)


# ----------------------------------------------------------------------------
# Layout helpers (host-side constants / cheap XLA layout plumbing)
# ----------------------------------------------------------------------------
def _pad_flat(x4, S_pad):
    """(N, C, h, w) -> (N, C, S_pad) zero-bordered, row-major flat, lane-padded."""
    N, C, h, w = x4.shape
    xp = jnp.pad(x4, ((0, 0), (0, 0), (1, 1), (1, 1)))
    flat = xp.reshape(N, C, (h + 2) * (w + 2))
    pad = S_pad - flat.shape[-1]
    if pad:
        flat = jnp.pad(flat, ((0, 0), (0, 0), (0, pad)))
    return flat


def _interior_mask(h, w, S_pad):
    Hp, Wp = h + 2, w + 2
    m = np.zeros((Hp, Wp), np.float32)
    m[1:h + 1, 1:w + 1] = 1.0
    flat = np.zeros((1, S_pad), np.float32)
    flat[0, :Hp * Wp] = m.reshape(-1)
    return jnp.asarray(flat)


def _pool_base(h, w):
    ho, wo = h // 2, w // 2
    ii = np.arange(ho, dtype=np.int32)[:, None]
    jj = np.arange(wo, dtype=np.int32)[None, :]
    return jnp.asarray(((2 * ii) * w + 2 * jj).reshape(1, ho * wo))


# ----------------------------------------------------------------------------
# EncoderSH parameters + forward
# ----------------------------------------------------------------------------
def init_encoder_params(key, filters, mid_layers=0, in_channels=3):
    """Synthetic parameters; shapes follow EncoderSH.__init__.  Conv weights
    are packed once at init from PyTorch's (Cout, Cin, 3, 3) into the bf16
    (Cout, 9*Cin) im2col layout (column order kh, kw, cin) the kernel uses."""
    def conv_layer_params(k, cin, cout):
        k1, k2, k3 = jax.random.split(k, 3)
        bound = 1.0 / (cin * 9) ** 0.5
        w = jax.random.uniform(k1, (cout, cin, 3, 3), jnp.float32, -bound, bound)
        w2 = jnp.transpose(w, (0, 2, 3, 1)).reshape(cout, 9 * cin).astype(MXU_DTYPE)
        gamma = 1.0 + 0.1 * jax.random.normal(k2, (cout,), jnp.float32)
        beta = 0.1 * jax.random.normal(k3, (cout,), jnp.float32)
        return {"w": w2, "gamma": gamma, "beta": beta}

    chans = [in_channels] + list(filters)
    keys = jax.random.split(key, len(filters) * (2 + mid_layers))
    ki = 0
    params = {"enc": [], "down": []}
    for i in range(len(filters)):
        cin, cout = chans[i], chans[i + 1]
        block = [conv_layer_params(keys[ki], cin, cout)]
        ki += 1
        for _ in range(mid_layers):
            block.append(conv_layer_params(keys[ki], cout, cout))
            ki += 1
        params["enc"].append(block)
        params["down"].append(conv_layer_params(keys[ki], cout, cout))
        ki += 1
    return params


def encoder_sh_forward(params, x_nchw):
    """Mirrors EncoderSH.forward; returns NCHW tensors like PyTorch."""
    N, _, H, W = x_nchw.shape
    n_stages = len(params["enc"])

    enc_layer, down_layer, down_indices, out = [], [], [], []
    h, w = H, W
    cur = _pad_flat(x_nchw.astype(jnp.float32), _round_up((h + 2) * (w + 2), 128))

    for stage in range(n_stages):
        Hp, Wp = h + 2, w + 2
        S = Hp * Wp
        S_pad = _round_up(S, 128)
        mask = _interior_mask(h, w, S_pad)
        count = float(N * h * w)
        layers = list(params["enc"][stage]) + [params["down"][stage]]

        # Conv layers of this stage (enc block + down conv), one fused
        # pallas_call each: apply previous BN+ReLU -> conv -> partial stats.
        x_in = cur
        a_prev = b_prev = None
        x_enc = None
        y = None
        for li, p in enumerate(layers):
            apply_prev = li > 0
            emit_applied = li == len(layers) - 1   # down conv emits enc activation
            res = _conv_layer_call(
                x_in, p["w"], mask, a_prev, b_prev,
                apply_prev=apply_prev, emit_applied=emit_applied,
                Wp=Wp, S_pad=S_pad)
            if emit_applied:
                y, stats, x_enc = res
            else:
                y, stats = res
            a_prev, b_prev = _bn_finalize(stats, p["gamma"], p["beta"], count)
            x_in = y

        F = y.shape[1]
        C_enc = x_enc.shape[1]
        enc4 = x_enc[:, :, :S].reshape(N, C_enc, Hp, Wp)[:, :, 1:h + 1, 1:w + 1]
        enc_layer.append(enc4)

        # Quarter-res split of the down-conv pre-BN output into the four 2x2
        # window candidates (XLA layout plumbing; read once, write once).
        ho, wo = h // 2, w // 2
        Q = ho * wo
        y4 = y[:, :, :S].reshape(N, F, Hp, Wp)[:, :, 1:h + 1, 1:w + 1]
        cands = [y4[:, :, di::2, dj::2].reshape(N, F, Q)
                 for di in range(2) for dj in range(2)]
        base = _pool_base(h, w)

        d00, d01, d10, d11, pmax, pidx = _pool_call(
            cands, base, a_prev, b_prev, width=w)

        # Reassemble full-res `down` (fused by XLA with the NCHW output it has
        # to build anyway -- no extra full-res writes from the kernel).
        dr = [d.reshape(N, F, ho, wo) for d in (d00, d01, d10, d11)]
        row0 = jnp.stack([dr[0], dr[1]], axis=-1).reshape(N, F, ho, w)
        row1 = jnp.stack([dr[2], dr[3]], axis=-1).reshape(N, F, ho, w)
        down4 = jnp.stack([row0, row1], axis=-2).reshape(N, F, h, w)
        down_layer.append(down4)

        pool4 = pmax.reshape(N, F, ho, wo)
        out.append(pool4)
        down_indices.append(pidx.reshape(N, F, ho, wo))

        # Next stage input: re-pad the (quarter-res) pooled map -- tiny XLA op.
        # TODO(synk): alias this through input_output_aliases to skip a copy.
        h, w = ho, wo
        if stage + 1 < n_stages:
            cur = _pad_flat(pool4, _round_up((h + 2) * (w + 2), 128))

    logits = out[-1]
    return logits, enc_layer, down_layer, down_indices, out


if __name__ == "__main__":
    key = jax.random.PRNGKey(0)
    kx, kp = jax.random.split(key)

    filters = (4, 8)            # EncoderSH(filter=[4, 8], mid_layers=0)
    x = jax.random.normal(kx, (2, 3, 16, 16), jnp.float32)   # NCHW input
    params = init_encoder_params(kp, filters, mid_layers=0)

    fwd = jax.jit(encoder_sh_forward)
    logits, enc_layer, down_layer, down_indices, out = fwd(params, x)

    jax.block_until_ready(logits)
    for t in enc_layer + down_layer + down_indices + out:
        jax.block_until_ready(t)

    assert logits.shape == (2, filters[-1], 4, 4), logits.shape
    assert enc_layer[0].shape == (2, 4, 16, 16)
    assert enc_layer[1].shape == (2, 8, 8, 8)
    assert down_layer[0].shape == (2, 4, 16, 16)
    assert down_layer[1].shape == (2, 8, 8, 8)
    assert down_indices[0].shape == (2, 4, 8, 8)
    assert down_indices[0].dtype == jnp.int32
    assert out[0].shape == (2, 4, 8, 8)
    print("KERNEL_OK")
</pallas_src>

<mosaic_0001>
module attributes {stable_mosaic.version = 11 : i64} {
  func.func @kernel(%arg0: i32, %arg1: memref<1x384xf32, #tpu.memory_space<vmem>>, %arg2: memref<1x3x384xf32, #tpu.memory_space<vmem>>, %arg3: memref<4x27xbf16, #tpu.memory_space<vmem>>, %arg4: memref<1x4x384xf32, #tpu.memory_space<vmem>>, %arg5: memref<1x4x2xf32, #tpu.memory_space<vmem>>) attributes {dimension_semantics = [#tpu.dimension_semantics<parallel>], iteration_bounds = array<i64: 2>, scalar_prefetch = 0 : i64, scratch_operands = 0 : i64, tpu.core_type = #tpu.core_type<tc>, window_params = [{pipeline_mode = #tpu.pipeline_mode<synchronous>, transform_indices = @transform_0, window_bounds = array<i64: 1, 384>}, {transform_indices = @transform_1, window_bounds = array<i64: 1, 3, 384>}, {pipeline_mode = #tpu.pipeline_mode<synchronous>, transform_indices = @transform_2, window_bounds = array<i64: 4, 27>}, {transform_indices = @transform_3, window_bounds = array<i64: 1, 4, 384>}, {transform_indices = @transform_4, window_bounds = array<i64: 1, 4, 2>}]} {
    %c0 = arith.constant 0 : index
    %c0_0 = arith.constant 0 : index
    %0 = vector.load %arg1[%c0, %c0_0] : memref<1x384xf32, #tpu.memory_space<vmem>>, vector<1x384xf32>
    %c0_1 = arith.constant 0 : index
    %c0_2 = arith.constant 0 : index
    %c0_3 = arith.constant 0 : index
    %1 = vector.load %arg2[%c0_1, %c0_2, %c0_3] : memref<1x3x384xf32, #tpu.memory_space<vmem>>, vector<1x3x384xf32>
    %2 = vector.shape_cast %1 : vector<1x3x384xf32> to vector<3x384xf32>
    %c19_i32 = arith.constant 19 : i32
    %3 = tpu.dynamic_rotate %2 by %c19_i32 dim 1 : vector<3x384xf32>, i32 -> vector<3x384xf32>
    %c18_i32 = arith.constant 18 : i32
    %4 = tpu.dynamic_rotate %2 by %c18_i32 dim 1 : vector<3x384xf32>, i32 -> vector<3x384xf32>
    %c17_i32 = arith.constant 17 : i32
    %5 = tpu.dynamic_rotate %2 by %c17_i32 dim 1 : vector<3x384xf32>, i32 -> vector<3x384xf32>
    %c1_i32 = arith.constant 1 : i32
    %6 = tpu.dynamic_rotate %2 by %c1_i32 dim 1 : vector<3x384xf32>, i32 -> vector<3x384xf32>
    %c383_i32 = arith.constant 383 : i32
    %7 = tpu.dynamic_rotate %2 by %c383_i32 dim 1 : vector<3x384xf32>, i32 -> vector<3x384xf32>
    %c367_i32 = arith.constant 367 : i32
    %8 = tpu.dynamic_rotate %2 by %c367_i32 dim 1 : vector<3x384xf32>, i32 -> vector<3x384xf32>
    %c366_i32 = arith.constant 366 : i32
    %9 = tpu.dynamic_rotate %2 by %c366_i32 dim 1 : vector<3x384xf32>, i32 -> vector<3x384xf32>
    %c365_i32 = arith.constant 365 : i32
    %10 = tpu.dynamic_rotate %2 by %c365_i32 dim 1 : vector<3x384xf32>, i32 -> vector<3x384xf32>
    %11 = tpu.concatenate %3, %4, %5, %6, %2, %7, %8, %9, %10 in 0 : vector<3x384xf32>, vector<3x384xf32>, vector<3x384xf32>, vector<3x384xf32>, vector<3x384xf32>, vector<3x384xf32>, vector<3x384xf32>, vector<3x384xf32>, vector<3x384xf32> -> vector<27x384xf32>
    %12 = arith.truncf %11 : vector<27x384xf32> to vector<27x384xbf16>
    %c0_4 = arith.constant 0 : index
    %c0_5 = arith.constant 0 : index
    %13 = vector.load %arg3[%c0_4, %c0_5] : memref<4x27xbf16, #tpu.memory_space<vmem>>, vector<4x27xbf16>
    %cst = arith.constant dense<0.000000e+00> : vector<4x384xf32>
    %14 = tpu.matmul %13, %12, %cst {dimension_numbers = #tpu.dot_dimension_numbers<[1], [0], [0], [1], [0, 0, 1, 1], [], []>} : vector<4x27xbf16>, vector<27x384xbf16>, vector<4x384xf32> -> vector<4x384xf32>
    %c0_6 = arith.constant 0 : index
    %c0_7 = arith.constant 0 : index
    %c0_8 = arith.constant 0 : index
    %15 = vector.load %arg4[%c0_6, %c0_7, %c0_8] : memref<1x4x384xf32, #tpu.memory_space<vmem>>, vector<1x4x384xf32>
    %16 = vector.shape_cast %15 : vector<1x4x384xf32> to vector<4x384xf32>
    %17 = vector.shape_cast %14 : vector<4x384xf32> to vector<1x4x384xf32>
    tpu.vector_store %arg4[%c0_6, %c0_7, %c0_8], %17 {strides = array<i32>} : memref<1x4x384xf32, #tpu.memory_space<vmem>>, vector<1x4x384xf32>,
    %18 = vector.broadcast %0 : vector<1x384xf32> to vector<4x384xf32>
    %19 = arith.mulf %14, %18 : vector<4x384xf32>
    %cst_9 = arith.constant dense<0.000000e+00> : vector<4xf32>
    %20 = vector.multi_reduction <add>, %19, %cst_9 [1] : vector<4x384xf32> to vector<4xf32>
    %21 = vector.shape_cast %20 : vector<4xf32> to vector<4x1xf32>
    %22 = arith.mulf %19, %19 : vector<4x384xf32>
    %cst_10 = arith.constant dense<0.000000e+00> : vector<4xf32>
    %23 = vector.multi_reduction <add>, %22, %cst_10 [1] : vector<4x384xf32> to vector<4xf32>
    %24 = vector.shape_cast %23 : vector<4xf32> to vector<4x1xf32>
    %25 = tpu.concatenate %21, %24 in 1 : vector<4x1xf32>, vector<4x1xf32> -> vector<4x2xf32>
    %c0_11 = arith.constant 0 : index
    %c0_12 = arith.constant 0 : index
    %c0_13 = arith.constant 0 : index
    %26 = vector.load %arg5[%c0_11, %c0_12, %c0_13] : memref<1x4x2xf32, #tpu.memory_space<vmem>>, vector<1x4x2xf32>
    %27 = vector.shape_cast %26 : vector<1x4x2xf32> to vector<4x2xf32>
    %28 = vector.shape_cast %25 : vector<4x2xf32> to vector<1x4x2xf32>
    tpu.vector_store %arg5[%c0_11, %c0_12, %c0_13], %28 {strides = array<i32>} : memref<1x4x2xf32, #tpu.memory_space<vmem>>, vector<1x4x2xf32>,
    return
  }
  func.func @transform_0(%arg0: i32) -> (i32, i32) {
    %c0_i32 = arith.constant 0 : i32
    %c0_i32_0 = arith.constant 0 : i32
    %c0_i32_1 = arith.constant 0 : i32
    return %c0_i32, %c0_i32_0 : i32, i32
  }
  func.func @transform_1(%arg0: i32) -> (i32, i32, i32) {
    %c0_i32 = arith.constant 0 : i32
    %c0_i32_0 = arith.constant 0 : i32
    %c0_i32_1 = arith.constant 0 : i32
    return %arg0, %c0_i32, %c0_i32_0 : i32, i32, i32
  }
  func.func @transform_2(%arg0: i32) -> (i32, i32) {
    %c0_i32 = arith.constant 0 : i32
    %c0_i32_0 = arith.constant 0 : i32
    %c0_i32_1 = arith.constant 0 : i32
    return %c0_i32, %c0_i32_0 : i32, i32
  }
  func.func @transform_3(%arg0: i32) -> (i32, i32, i32) {
    %c0_i32 = arith.constant 0 : i32
    %c0_i32_0 = arith.constant 0 : i32
    %c0_i32_1 = arith.constant 0 : i32
    return %arg0, %c0_i32, %c0_i32_0 : i32, i32, i32
  }
  func.func @transform_4(%arg0: i32) -> (i32, i32, i32) {
    %c0_i32 = arith.constant 0 : i32
    %c0_i32_0 = arith.constant 0 : i32
    %c0_i32_1 = arith.constant 0 : i32
    return %arg0, %c0_i32, %c0_i32_0 : i32, i32, i32
  }
}

module attributes {stable_mosaic.version = 11 : i64} {
  func.func @kernel(%arg0: i32, %arg1: memref<1x384xf32, #tpu.memory_space<vmem>>, %arg2: memref<1x4x384xf32, #tpu.memory_space<vmem>>, %arg3: memref<4x36xbf16, #tpu.memory_space<vmem>>, %arg4: memref<4x1xf32, #tpu.memory_space<vmem>>, %arg5: memref<4x1xf32, #tpu.memory_space<vmem>>, %arg6: memref<1x4x384xf32, #tpu.memory_space<vmem>>, %arg7: memref<1x4x2xf32, #tpu.memory_space<vmem>>, %arg8: memref<1x4x384xf32, #tpu.memory_space<vmem>>) attributes {dimension_semantics = [#tpu.dimension_semantics<parallel>], iteration_bounds = array<i64: 2>, scalar_prefetch = 0 : i64, scratch_operands = 0 : i64, tpu.core_type = #tpu.core_type<tc>, window_params = [{pipeline_mode = #tpu.pipeline_mode<synchronous>, transform_indices = @transform_0, window_bounds = array<i64: 1, 384>}, {transform_indices = @transform_1, window_bounds = array<i64: 1, 4, 384>}, {pipeline_mode = #tpu.pipeline_mode<synchronous>, transform_indices = @transform_2, window_bounds = array<i64: 4, 36>}, {pipeline_mode = #tpu.pipeline_mode<synchronous>, transform_indices = @transform_3, window_bounds = array<i64: 4, 1>}, {pipeline_mode = #tpu.pipeline_mode<synchronous>, transform_indices = @transform_4, window_bounds = array<i64: 4, 1>}, {transform_indices = @transform_5, window_bounds = array<i64: 1, 4, 384>}, {transform_indices = @transform_6, window_bounds = array<i64: 1, 4, 2>}, {transform_indices = @transform_7, window_bounds = array<i64: 1, 4, 384>}]} {
    %c0 = arith.constant 0 : index
    %c0_0 = arith.constant 0 : index
    %0 = vector.load %arg1[%c0, %c0_0] : memref<1x384xf32, #tpu.memory_space<vmem>>, vector<1x384xf32>
    %c0_1 = arith.constant 0 : index
    %c0_2 = arith.constant 0 : index
    %c0_3 = arith.constant 0 : index
    %1 = vector.load %arg2[%c0_1, %c0_2, %c0_3] : memref<1x4x384xf32, #tpu.memory_space<vmem>>, vector<1x4x384xf32>
    %2 = vector.shape_cast %1 : vector<1x4x384xf32> to vector<4x384xf32>
    %c0_4 = arith.constant 0 : index
    %c0_5 = arith.constant 0 : index
    %3 = vector.load %arg4[%c0_4, %c0_5] : memref<4x1xf32, #tpu.memory_space<vmem>>, vector<4x1xf32>
    %4 = vector.broadcast %3 : vector<4x1xf32> to vector<4x384xf32>
    %5 = arith.mulf %2, %4 : vector<4x384xf32>
    %c0_6 = arith.constant 0 : index
    %c0_7 = arith.constant 0 : index
    %6 = vector.load %arg5[%c0_6, %c0_7] : memref<4x1xf32, #tpu.memory_space<vmem>>, vector<4x1xf32>
    %7 = vector.broadcast %6 : vector<4x1xf32> to vector<4x384xf32>
    %8 = arith.addf %5, %7 : vector<4x384xf32>
    %cst = arith.constant 0.000000e+00 : f32
    %9 = vector.broadcast %cst : f32 to vector<4x384xf32>
    %10 = arith.maximumf %8, %9 : vector<4x384xf32>
    %11 = vector.broadcast %0 : vector<1x384xf32> to vector<4x384xf32>
    %12 = arith.mulf %10, %11 : vector<4x384xf32>
    %c0_8 = arith.constant 0 : index
    %c0_9 = arith.constant 0 : index
    %c0_10 = arith.constant 0 : index
    %13 = vector.load %arg8[%c0_8, %c0_9, %c0_10] : memref<1x4x384xf32, #tpu.memory_space<vmem>>, vector<1x4x384xf32>
    %14 = vector.shape_cast %13 : vector<1x4x384xf32> to vector<4x384xf32>
    %15 = vector.shape_cast %12 : vector<4x384xf32> to vector<1x4x384xf32>
    tpu.vector_store %arg8[%c0_8, %c0_9, %c0_10], %15 {strides = array<i32>} : memref<1x4x384xf32, #tpu.memory_space<vmem>>, vector<1x4x384xf32>,
    %c19_i32 = arith.constant 19 : i32
    %16 = tpu.dynamic_rotate %12 by %c19_i32 dim 1 : vector<4x384xf32>, i32 -> vector<4x384xf32>
    %c18_i32 = arith.constant 18 : i32
    %17 = tpu.dynamic_rotate %12 by %c18_i32 dim 1 : vector<4x384xf32>, i32 -> vector<4x384xf32>
    %c17_i32 = arith.constant 17 : i32
    %18 = tpu.dynamic_rotate %12 by %c17_i32 dim 1 : vector<4x384xf32>, i32 -> vector<4x384xf32>
    %c1_i32 = arith.constant 1 : i32
    %19 = tpu.dynamic_rotate %12 by %c1_i32 dim 1 : vector<4x384xf32>, i32 -> vector<4x384xf32>
    %c383_i32 = arith.constant 383 : i32
    %20 = tpu.dynamic_rotate %12 by %c383_i32 dim 1 : vector<4x384xf32>, i32 -> vector<4x384xf32>
    %c367_i32 = arith.constant 367 : i32
    %21 = tpu.dynamic_rotate %12 by %c367_i32 dim 1 : vector<4x384xf32>, i32 -> vector<4x384xf32>
    %c366_i32 = arith.constant 366 : i32
    %22 = tpu.dynamic_rotate %12 by %c366_i32 dim 1 : vector<4x384xf32>, i32 -> vector<4x384xf32>
    %c365_i32 = arith.constant 365 : i32
    %23 = tpu.dynamic_rotate %12 by %c365_i32 dim 1 : vector<4x384xf32>, i32 -> vector<4x384xf32>
    %24 = tpu.concatenate %16, %17, %18, %19, %12, %20, %21, %22, %23 in 0 : vector<4x384xf32>, vector<4x384xf32>, vector<4x384xf32>, vector<4x384xf32>, vector<4x384xf32>, vector<4x384xf32>, vector<4x384xf32>, vector<4x384xf32>, vector<4x384xf32> -> vector<36x384xf32>
    %25 = arith.truncf %24 : vector<36x384xf32> to vector<36x384xbf16>
    %c0_11 = arith.constant 0 : index
    %c0_12 = arith.constant 0 : index
    %26 = vector.load %arg3[%c0_11, %c0_12] : memref<4x36xbf16, #tpu.memory_space<vmem>>, vector<4x36xbf16>
    %cst_13 = arith.constant dense<0.000000e+00> : vector<4x384xf32>
    %27 = tpu.matmul %26, %25, %cst_13 {dimension_numbers = #tpu.dot_dimension_numbers<[1], [0], [0], [1], [0, 0, 1, 1], [], []>} : vector<4x36xbf16>, vector<36x384xbf16>, vector<4x384xf32> -> vector<4x384xf32>
    %c0_14 = arith.constant 0 : index
    %c0_15 = arith.constant 0 : index
    %c0_16 = arith.constant 0 : index
    %28 = vector.load %arg6[%c0_14, %c0_15, %c0_16] : memref<1x4x384xf32, #tpu.memory_space<vmem>>, vector<1x4x384xf32>
    %29 = vector.shape_cast %28 : vector<1x4x384xf32> to vector<4x384xf32>
    %30 = vector.shape_cast %27 : vector<4x384xf32> to vector<1x4x384xf32>
    tpu.vector_store %arg6[%c0_14, %c0_15, %c0_16], %30 {strides = array<i32>} : memref<1x4x384xf32, #tpu.memory_space<vmem>>, vector<1x4x384xf32>,
    %31 = vector.broadcast %0 : vector<1x384xf32> to vector<4x384xf32>
    %32 = arith.mulf %27, %31 : vector<4x384xf32>
    %cst_17 = arith.constant dense<0.000000e+00> : vector<4xf32>
    %33 = vector.multi_reduction <add>, %32, %cst_17 [1] : vector<4x384xf32> to vector<4xf32>
    %34 = vector.shape_cast %33 : vector<4xf32> to vector<4x1xf32>
    %35 = arith.mulf %32, %32 : vector<4x384xf32>
    %cst_18 = arith.constant dense<0.000000e+00> : vector<4xf32>
    %36 = vector.multi_reduction <add>, %35, %cst_18 [1] : vector<4x384xf32> to vector<4xf32>
    %37 = vector.shape_cast %36 : vector<4xf32> to vector<4x1xf32>
    %38 = tpu.concatenate %34, %37 in 1 : vector<4x1xf32>, vector<4x1xf32> -> vector<4x2xf32>
    %c0_19 = arith.constant 0 : index
    %c0_20 = arith.constant 0 : index
    %c0_21 = arith.constant 0 : index
    %39 = vector.load %arg7[%c0_19, %c0_20, %c0_21] : memref<1x4x2xf32, #tpu.memory_space<vmem>>, vector<1x4x2xf32>
    %40 = vector.shape_cast %39 : vector<1x4x2xf32> to vector<4x2xf32>
    %41 = vector.shape_cast %38 : vector<4x2xf32> to vector<1x4x2xf32>
    tpu.vector_store %arg7[%c0_19, %c0_20, %c0_21], %41 {strides = array<i32>} : memref<1x4x2xf32, #tpu.memory_space<vmem>>, vector<1x4x2xf32>,
    return
  }
  func.func @transform_0(%arg0: i32) -> (i32, i32) {
    %c0_i32 = arith.constant 0 : i32
    %c0_i32_0 = arith.constant 0 : i32
    %c0_i32_1 = arith.constant 0 : i32
    return %c0_i32, %c0_i32_0 : i32, i32
  }
  func.func @transform_1(%arg0: i32) -> (i32, i32, i32) {
    %c0_i32 = arith.constant 0 : i32
    %c0_i32_0 = arith.constant 0 : i32
    %c0_i32_1 = arith.constant 0 : i32
    return %arg0, %c0_i32, %c0_i32_0 : i32, i32, i32
  }
  func.func @transform_2(%arg0: i32) -> (i32, i32) {
    %c0_i32 = arith.constant 0 : i32
    %c0_i32_0 = arith.constant 0 : i32
    %c0_i32_1 = arith.constant 0 : i32
    return %c0_i32, %c0_i32_0 : i32, i32
  }
  func.func @transform_3(%arg0: i32) -> (i32, i32) {
    %c0_i32 = arith.constant 0 : i32
    %c0_i32_0 = arith.constant 0 : i32
    %c0_i32_1 = arith.constant 0 : i32
    return %c0_i32, %c0_i32_0 : i32, i32
  }
  func.func @transform_4(%arg0: i32) -> (i32, i32) {
    %c0_i32 = arith.constant 0 : i32
    %c0_i32_0 = arith.constant 0 : i32
    %c0_i32_1 = arith.constant 0 : i32
    return %c0_i32, %c0_i32_0 : i32, i32
  }
  func.func @transform_5(%arg0: i32) -> (i32, i32, i32) {
    %c0_i32 = arith.constant 0 : i32
    %c0_i32_0 = arith.constant 0 : i32
    %c0_i32_1 = arith.constant 0 : i32
    return %arg0, %c0_i32, %c0_i32_0 : i32, i32, i32
  }
  func.func @transform_6(%arg0: i32) -> (i32, i32, i32) {
    %c0_i32 = arith.constant 0 : i32
    %c0_i32_0 = arith.constant 0 : i32
    %c0_i32_1 = arith.constant 0 : i32
    return %arg0, %c0_i32, %c0_i32_0 : i32, i32, i32
  }
  func.func @transform_7(%arg0: i32) -> (i32, i32, i32) {
    %c0_i32 = arith.constant 0 : i32
    %c0_i32_0 = arith.constant 0 : i32
    %c0_i32_1 = arith.constant 0 : i32
    return %arg0, %c0_i32, %c0_i32_0 : i32, i32, i32
  }
}

module attributes {stable_mosaic.version = 11 : i64} {
  func.func @kernel(%arg0: i32, %arg1: memref<1x64xi32, #tpu.memory_space<vmem>>, %arg2: memref<1x4x64xf32, #tpu.memory_space<vmem>>, %arg3: memref<1x4x64xf32, #tpu.memory_space<vmem>>, %arg4: memref<1x4x64xf32, #tpu.memory_space<vmem>>, %arg5: memref<1x4x64xf32, #tpu.memory_space<vmem>>, %arg6: memref<4x1xf32, #tpu.memory_space<vmem>>, %arg7: memref<4x1xf32, #tpu.memory_space<vmem>>, %arg8: memref<1x4x64xf32, #tpu.memory_space<vmem>>, %arg9: memref<1x4x64xf32, #tpu.memory_space<vmem>>, %arg10: memref<1x4x64xf32, #tpu.memory_space<vmem>>, %arg11: memref<1x4x64xf32, #tpu.memory_space<vmem>>, %arg12: memref<1x4x64xf32, #tpu.memory_space<vmem>>, %arg13: memref<1x4x64xi32, #tpu.memory_space<vmem>>) attributes {dimension_semantics = [#tpu.dimension_semantics<parallel>], iteration_bounds = array<i64: 2>, scalar_prefetch = 0 : i64, scratch_operands = 0 : i64, tpu.core_type = #tpu.core_type<tc>, window_params = [{pipeline_mode = #tpu.pipeline_mode<synchronous>, transform_indices = @transform_0, window_bounds = array<i64: 1, 64>}, {transform_indices = @transform_1, window_bounds = array<i64: 1, 4, 64>}, {transform_indices = @transform_2, window_bounds = array<i64: 1, 4, 64>}, {transform_indices = @transform_3, window_bounds = array<i64: 1, 4, 64>}, {transform_indices = @transform_4, window_bounds = array<i64: 1, 4, 64>}, {pipeline_mode = #tpu.pipeline_mode<synchronous>, transform_indices = @transform_5, window_bounds = array<i64: 4, 1>}, {pipeline_mode = #tpu.pipeline_mode<synchronous>, transform_indices = @transform_6, window_bounds = array<i64: 4, 1>}, {transform_indices = @transform_7, window_bounds = array<i64: 1, 4, 64>}, {transform_indices = @transform_8, window_bounds = array<i64: 1, 4, 64>}, {transform_indices = @transform_9, window_bounds = array<i64: 1, 4, 64>}, {transform_indices = @transform_10, window_bounds = array<i64: 1, 4, 64>}, {transform_indices = @transform_11, window_bounds = array<i64: 1, 4, 64>}, {transform_indices = @transform_12, window_bounds = array<i64: 1, 4, 64>}]} {
    %c0 = arith.constant 0 : index
    %c0_0 = arith.constant 0 : index
    %0 = vector.load %arg6[%c0, %c0_0] : memref<4x1xf32, #tpu.memory_space<vmem>>, vector<4x1xf32>
    %c0_1 = arith.constant 0 : index
    %c0_2 = arith.constant 0 : index
    %1 = vector.load %arg7[%c0_1, %c0_2] : memref<4x1xf32, #tpu.memory_space<vmem>>, vector<4x1xf32>
    %c0_3 = arith.constant 0 : index
    %c0_4 = arith.constant 0 : index
    %2 = vector.load %arg1[%c0_3, %c0_4] : memref<1x64xi32, #tpu.memory_space<vmem>>, vector<1x64xi32>
    %c0_5 = arith.constant 0 : index
    %c0_6 = arith.constant 0 : index
    %c0_7 = arith.constant 0 : index
    %3 = vector.load %arg2[%c0_5, %c0_6, %c0_7] : memref<1x4x64xf32, #tpu.memory_space<vmem>>, vector<1x4x64xf32>
    %4 = vector.shape_cast %3 : vector<1x4x64xf32> to vector<4x64xf32>
    %5 = vector.broadcast %0 : vector<4x1xf32> to vector<4x64xf32>
    %6 = arith.mulf %4, %5 : vector<4x64xf32>
    %7 = vector.broadcast %1 : vector<4x1xf32> to vector<4x64xf32>
    %8 = arith.addf %6, %7 : vector<4x64xf32>
    %cst = arith.constant 0.000000e+00 : f32
    %9 = vector.broadcast %cst : f32 to vector<4x64xf32>
    %10 = arith.maximumf %8, %9 : vector<4x64xf32>
    %c0_8 = arith.constant 0 : index
    %c0_9 = arith.constant 0 : index
    %c0_10 = arith.constant 0 : index
    %11 = vector.load %arg8[%c0_8, %c0_9, %c0_10] : memref<1x4x64xf32, #tpu.memory_space<vmem>>, vector<1x4x64xf32>
    %12 = vector.shape_cast %11 : vector<1x4x64xf32> to vector<4x64xf32>
    %13 = vector.shape_cast %10 : vector<4x64xf32> to vector<1x4x64xf32>
    tpu.vector_store %arg8[%c0_8, %c0_9, %c0_10], %13 {strides = array<i32>} : memref<1x4x64xf32, #tpu.memory_space<vmem>>, vector<1x4x64xf32>,
    %c0_11 = arith.constant 0 : index
    %c0_12 = arith.constant 0 : index
    %c0_13 = arith.constant 0 : index
    %14 = vector.load %arg3[%c0_11, %c0_12, %c0_13] : memref<1x4x64xf32, #tpu.memory_space<vmem>>, vector<1x4x64xf32>
    %15 = vector.shape_cast %14 : vector<1x4x64xf32> to vector<4x64xf32>
    %16 = vector.broadcast %0 : vector<4x1xf32> to vector<4x64xf32>
    %17 = arith.mulf %15, %16 : vector<4x64xf32>
    %18 = vector.broadcast %1 : vector<4x1xf32> to vector<4x64xf32>
    %19 = arith.addf %17, %18 : vector<4x64xf32>
    %cst_14 = arith.constant 0.000000e+00 : f32
    %20 = vector.broadcast %cst_14 : f32 to vector<4x64xf32>
    %21 = arith.maximumf %19, %20 : vector<4x64xf32>
    %c0_15 = arith.constant 0 : index
    %c0_16 = arith.constant 0 : index
    %c0_17 = arith.constant 0 : index
    %22 = vector.load %arg9[%c0_15, %c0_16, %c0_17] : memref<1x4x64xf32, #tpu.memory_space<vmem>>, vector<1x4x64xf32>
    %23 = vector.shape_cast %22 : vector<1x4x64xf32> to vector<4x64xf32>
    %24 = vector.shape_cast %21 : vector<4x64xf32> to vector<1x4x64xf32>
    tpu.vector_store %arg9[%c0_15, %c0_16, %c0_17], %24 {strides = array<i32>} : memref<1x4x64xf32, #tpu.memory_space<vmem>>, vector<1x4x64xf32>,
    %c0_18 = arith.constant 0 : index
    %c0_19 = arith.constant 0 : index
    %c0_20 = arith.constant 0 : index
    %25 = vector.load %arg4[%c0_18, %c0_19, %c0_20] : memref<1x4x64xf32, #tpu.memory_space<vmem>>, vector<1x4x64xf32>
    %26 = vector.shape_cast %25 : vector<1x4x64xf32> to vector<4x64xf32>
    %27 = vector.broadcast %0 : vector<4x1xf32> to vector<4x64xf32>
    %28 = arith.mulf %26, %27 : vector<4x64xf32>
    %29 = vector.broadcast %1 : vector<4x1xf32> to vector<4x64xf32>
    %30 = arith.addf %28, %29 : vector<4x64xf32>
    %cst_21 = arith.constant 0.000000e+00 : f32
    %31 = vector.broadcast %cst_21 : f32 to vector<4x64xf32>
    %32 = arith.maximumf %30, %31 : vector<4x64xf32>
    %c0_22 = arith.constant 0 : index
    %c0_23 = arith.constant 0 : index
    %c0_24 = arith.constant 0 : index
    %33 = vector.load %arg10[%c0_22, %c0_23, %c0_24] : memref<1x4x64xf32, #tpu.memory_space<vmem>>, vector<1x4x64xf32>
    %34 = vector.shape_cast %33 : vector<1x4x64xf32> to vector<4x64xf32>
    %35 = vector.shape_cast %32 : vector<4x64xf32> to vector<1x4x64xf32>
    tpu.vector_store %arg10[%c0_22, %c0_23, %c0_24], %35 {strides = array<i32>} : memref<1x4x64xf32, #tpu.memory_space<vmem>>, vector<1x4x64xf32>,
    %c0_25 = arith.constant 0 : index
    %c0_26 = arith.constant 0 : index
    %c0_27 = arith.constant 0 : index
    %36 = vector.load %arg5[%c0_25, %c0_26, %c0_27] : memref<1x4x64xf32, #tpu.memory_space<vmem>>, vector<1x4x64xf32>
    %37 = vector.shape_cast %36 : vector<1x4x64xf32> to vector<4x64xf32>
    %38 = vector.broadcast %0 : vector<4x1xf32> to vector<4x64xf32>
    %39 = arith.mulf %37, %38 : vector<4x64xf32>
    %40 = vector.broadcast %1 : vector<4x1xf32> to vector<4x64xf32>
    %41 = arith.addf %39, %40 : vector<4x64xf32>
    %cst_28 = arith.constant 0.000000e+00 : f32
    %42 = vector.broadcast %cst_28 : f32 to vector<4x64xf32>
    %43 = arith.maximumf %41, %42 : vector<4x64xf32>
    %c0_29 = arith.constant 0 : index
    %c0_30 = arith.constant 0 : index
    %c0_31 = arith.constant 0 : index
    %44 = vector.load %arg11[%c0_29, %c0_30, %c0_31] : memref<1x4x64xf32, #tpu.memory_space<vmem>>, vector<1x4x64xf32>
    %45 = vector.shape_cast %44 : vector<1x4x64xf32> to vector<4x64xf32>
    %46 = vector.shape_cast %43 : vector<4x64xf32> to vector<1x4x64xf32>
    tpu.vector_store %arg11[%c0_29, %c0_30, %c0_31], %46 {strides = array<i32>} : memref<1x4x64xf32, #tpu.memory_space<vmem>>, vector<1x4x64xf32>,
    %c0_i32 = arith.constant 0 : i32
    %47 = vector.broadcast %c0_i32 : i32 to vector<1x64xi32>
    %48 = arith.addi %2, %47 : vector<1x64xi32>
    %49 = vector.shape_cast %48 : vector<1x64xi32> to vector<1x64xi32>
    %50 = vector.broadcast %49 : vector<1x64xi32> to vector<4x64xi32>
    %51 = arith.cmpf ogt, %21, %10 : vector<4x64xf32>
    %c1_i32 = arith.constant 1 : i32
    %52 = vector.broadcast %c1_i32 : i32 to vector<1x64xi32>
    %53 = arith.addi %2, %52 : vector<1x64xi32>
    %54 = vector.shape_cast %53 : vector<1x64xi32> to vector<1x64xi32>
    %55 = vector.broadcast %54 : vector<1x64xi32> to vector<4x64xi32>
    %56 = arith.select %51, %55, %50 : vector<4x64xi1>, vector<4x64xi32>
    %57 = arith.select %51, %21, %10 : vector<4x64xi1>, vector<4x64xf32>
    %58 = arith.cmpf ogt, %32, %57 : vector<4x64xf32>
    %c16_i32 = arith.constant 16 : i32
    %59 = vector.broadcast %c16_i32 : i32 to vector<1x64xi32>
    %60 = arith.addi %2, %59 : vector<1x64xi32>
    %61 = vector.shape_cast %60 : vector<1x64xi32> to vector<1x64xi32>
    %62 = vector.broadcast %61 : vector<1x64xi32> to vector<4x64xi32>
    %63 = arith.select %58, %62, %56 : vector<4x64xi1>, vector<4x64xi32>
    %64 = arith.select %58, %32, %57 : vector<4x64xi1>, vector<4x64xf32>
    %65 = arith.cmpf ogt, %43, %64 : vector<4x64xf32>
    %c17_i32 = arith.constant 17 : i32
    %66 = vector.broadcast %c17_i32 : i32 to vector<1x64xi32>
    %67 = arith.addi %2, %66 : vector<1x64xi32>
    %68 = vector.shape_cast %67 : vector<1x64xi32> to vector<1x64xi32>
    %69 = vector.broadcast %68 : vector<1x64xi32> to vector<4x64xi32>
    %70 = arith.select %65, %69, %63 : vector<4x64xi1>, vector<4x64xi32>
    %71 = arith.select %65, %43, %64 : vector<4x64xi1>, vector<4x64xf32>
    %c0_32 = arith.constant 0 : index
    %c0_33 = arith.constant 0 : index
    %c0_34 = arith.constant 0 : index
    %72 = vector.load %arg12[%c0_32, %c0_33, %c0_34] : memref<1x4x64xf32, #tpu.memory_space<vmem>>, vector<1x4x64xf32>
    %73 = vector.shape_cast %72 : vector<1x4x64xf32> to vector<4x64xf32>
    %74 = vector.shape_cast %71 : vector<4x64xf32> to vector<1x4x64xf32>
    tpu.vector_store %arg12[%c0_32, %c0_33, %c0_34], %74 {strides = array<i32>} : memref<1x4x64xf32, #tpu.memory_space<vmem>>, vector<1x4x64xf32>,
    %c0_35 = arith.constant 0 : index
    %c0_36 = arith.constant 0 : index
    %c0_37 = arith.constant 0 : index
    %75 = vector.load %arg13[%c0_35, %c0_36, %c0_37] : memref<1x4x64xi32, #tpu.memory_space<vmem>>, vector<1x4x64xi32>
    %76 = vector.shape_cast %75 : vector<1x4x64xi32> to vector<4x64xi32>
    %77 = vector.shape_cast %70 : vector<4x64xi32> to vector<1x4x64xi32>
    tpu.vector_store %arg13[%c0_35, %c0_36, %c0_37], %77 {strides = array<i32>} : memref<1x4x64xi32, #tpu.memory_space<vmem>>, vector<1x4x64xi32>,
    return
  }
  func.func @transform_0(%arg0: i32) -> (i32, i32) {
    %c0_i32 = arith.constant 0 : i32
    %c0_i32_0 = arith.constant 0 : i32
    %c0_i32_1 = arith.constant 0 : i32
    return %c0_i32, %c0_i32_0 : i32, i32
  }
  func.func @transform_1(%arg0: i32) -> (i32, i32, i32) {
    %c0_i32 = arith.constant 0 : i32
    %c0_i32_0 = arith.constant 0 : i32
    %c0_i32_1 = arith.constant 0 : i32
    return %arg0, %c0_i32, %c0_i32_0 : i32, i32, i32
  }
  func.func @transform_2(%arg0: i32) -> (i32, i32, i32) {
    %c0_i32 = arith.constant 0 : i32
    %c0_i32_0 = arith.constant 0 : i32
    %c0_i32_1 = arith.constant 0 : i32
    return %arg0, %c0_i32, %c0_i32_0 : i32, i32, i32
  }
  func.func @transform_3(%arg0: i32) -> (i32, i32, i32) {
    %c0_i32 = arith.constant 0 : i32
    %c0_i32_0 = arith.constant 0 : i32
    %c0_i32_1 = arith.constant 0 : i32
    return %arg0, %c0_i32, %c0_i32_0 : i32, i32, i32
  }
  func.func @transform_4(%arg0: i32) -> (i32, i32, i32) {
    %c0_i32 = arith.constant 0 : i32
    %c0_i32_0 = arith.constant 0 : i32
    %c0_i32_1 = arith.constant 0 : i32
    return %arg0, %c0_i32, %c0_i32_0 : i32, i32, i32
  }
  func.func @transform_5(%arg0: i32) -> (i32, i32) {
    %c0_i32 = arith.constant 0 : i32
    %c0_i32_0 = arith.constant 0 : i32
    %c0_i32_1 = arith.constant 0 : i32
    return %c0_i32, %c0_i32_0 : i32, i32
  }
  func.func @transform_6(%arg0: i32) -> (i32, i32) {
    %c0_i32 = arith.constant 0 : i32
    %c0_i32_0 = arith.constant 0 : i32
    %c0_i32_1 = arith.constant 0 : i32
    return %c0_i32, %c0_i32_0 : i32, i32
  }
  func.func @transform_7(%arg0: i32) -> (i32, i32, i32) {
    %c0_i32 = arith.constant 0 : i32
    %c0_i32_0 = arith.constant 0 : i32
    %c0_i32_1 = arith.constant 0 : i32
    return %arg0, %c0_i32, %c0_i32_0 : i32, i32, i32
  }
  func.func @transform_8(%arg0: i32) -> (i32, i32, i32) {
    %c0_i32 = arith.constant 0 : i32
    %c0_i32_0 = arith.constant 0 : i32
    %c0_i32_1 = arith.constant 0 : i32
    return %arg0, %c0_i32, %c0_i32_0 : i32, i32, i32
  }
  func.func @transform_9(%arg0: i32) -> (i32, i32, i32) {
    %c0_i32 = arith.constant 0 : i32
    %c0_i32_0 = arith.constant 0 : i32
    %c0_i32_1 = arith.constant 0 : i32
    return %arg0, %c0_i32, %c0_i32_0 : i32, i32, i32
  }
  func.func @transform_10(%arg0: i32) -> (i32, i32, i32) {
    %c0_i32 = arith.constant 0 : i32
    %c0_i32_0 = arith.constant 0 : i32
    %c0_i32_1 = arith.constant 0 : i32
    return %arg0, %c0_i32, %c0_i32_0 : i32, i32, i32
  }
  func.func @transform_11(%arg0: i32) -> (i32, i32, i32) {
    %c0_i32 = arith.constant 0 : i32
    %c0_i32_0 = arith.constant 0 : i32
    %c0_i32_1 = arith.constant 0 : i32
    return %arg0, %c0_i32, %c0_i32_0 : i32, i32, i32
  }
  func.func @transform_12(%arg0: i32) -> (i32, i32, i32) {
    %c0_i32 = arith.constant 0 : i32
    %c0_i32_0 = arith.constant 0 : i32
    %c0_i32_1 = arith.constant 0 : i32
    return %arg0, %c0_i32, %c0_i32_0 : i32, i32, i32
  }
}

module attributes {stable_mosaic.version = 11 : i64} {
  func.func @kernel(%arg0: i32, %arg1: memref<1x128xf32, #tpu.memory_space<vmem>>, %arg2: memref<1x8x128xf32, #tpu.memory_space<vmem>>, %arg3: memref<8x72xbf16, #tpu.memory_space<vmem>>, %arg4: memref<8x1xf32, #tpu.memory_space<vmem>>, %arg5: memref<8x1xf32, #tpu.memory_space<vmem>>, %arg6: memref<1x8x128xf32, #tpu.memory_space<vmem>>, %arg7: memref<1x8x2xf32, #tpu.memory_space<vmem>>, %arg8: memref<1x8x128xf32, #tpu.memory_space<vmem>>) attributes {dimension_semantics = [#tpu.dimension_semantics<parallel>], iteration_bounds = array<i64: 2>, scalar_prefetch = 0 : i64, scratch_operands = 0 : i64, tpu.core_type = #tpu.core_type<tc>, window_params = [{pipeline_mode = #tpu.pipeline_mode<synchronous>, transform_indices = @transform_0, window_bounds = array<i64: 1, 128>}, {transform_indices = @transform_1, window_bounds = array<i64: 1, 8, 128>}, {pipeline_mode = #tpu.pipeline_mode<synchronous>, transform_indices = @transform_2, window_bounds = array<i64: 8, 72>}, {pipeline_mode = #tpu.pipeline_mode<synchronous>, transform_indices = @transform_3, window_bounds = array<i64: 8, 1>}, {pipeline_mode = #tpu.pipeline_mode<synchronous>, transform_indices = @transform_4, window_bounds = array<i64: 8, 1>}, {transform_indices = @transform_5, window_bounds = array<i64: 1, 8, 128>}, {transform_indices = @transform_6, window_bounds = array<i64: 1, 8, 2>}, {transform_indices = @transform_7, window_bounds = array<i64: 1, 8, 128>}]} {
    %c0 = arith.constant 0 : index
    %c0_0 = arith.constant 0 : index
    %0 = vector.load %arg1[%c0, %c0_0] : memref<1x128xf32, #tpu.memory_space<vmem>>, vector<1x128xf32>
    %c0_1 = arith.constant 0 : index
    %c0_2 = arith.constant 0 : index
    %c0_3 = arith.constant 0 : index
    %1 = vector.load %arg2[%c0_1, %c0_2, %c0_3] : memref<1x8x128xf32, #tpu.memory_space<vmem>>, vector<1x8x128xf32>
    %2 = vector.shape_cast %1 : vector<1x8x128xf32> to vector<8x128xf32>
    %c0_4 = arith.constant 0 : index
    %c0_5 = arith.constant 0 : index
    %3 = vector.load %arg4[%c0_4, %c0_5] : memref<8x1xf32, #tpu.memory_space<vmem>>, vector<8x1xf32>
    %4 = vector.broadcast %3 : vector<8x1xf32> to vector<8x128xf32>
    %5 = arith.mulf %2, %4 : vector<8x128xf32>
    %c0_6 = arith.constant 0 : index
    %c0_7 = arith.constant 0 : index
    %6 = vector.load %arg5[%c0_6, %c0_7] : memref<8x1xf32, #tpu.memory_space<vmem>>, vector<8x1xf32>
    %7 = vector.broadcast %6 : vector<8x1xf32> to vector<8x128xf32>
    %8 = arith.addf %5, %7 : vector<8x128xf32>
    %cst = arith.constant 0.000000e+00 : f32
    %9 = vector.broadcast %cst : f32 to vector<8x128xf32>
    %10 = arith.maximumf %8, %9 : vector<8x128xf32>
    %11 = vector.broadcast %0 : vector<1x128xf32> to vector<8x128xf32>
    %12 = arith.mulf %10, %11 : vector<8x128xf32>
    %c0_8 = arith.constant 0 : index
    %c0_9 = arith.constant 0 : index
    %c0_10 = arith.constant 0 : index
    %13 = vector.load %arg8[%c0_8, %c0_9, %c0_10] : memref<1x8x128xf32, #tpu.memory_space<vmem>>, vector<1x8x128xf32>
    %14 = vector.shape_cast %13 : vector<1x8x128xf32> to vector<8x128xf32>
    %15 = vector.shape_cast %12 : vector<8x128xf32> to vector<1x8x128xf32>
    tpu.vector_store %arg8[%c0_8, %c0_9, %c0_10], %15 {strides = array<i32>} : memref<1x8x128xf32, #tpu.memory_space<vmem>>, vector<1x8x128xf32>,
    %c11_i32 = arith.constant 11 : i32
    %16 = tpu.dynamic_rotate %12 by %c11_i32 dim 1 : vector<8x128xf32>, i32 -> vector<8x128xf32>
    %c10_i32 = arith.constant 10 : i32
    %17 = tpu.dynamic_rotate %12 by %c10_i32 dim 1 : vector<8x128xf32>, i32 -> vector<8x128xf32>
    %c9_i32 = arith.constant 9 : i32
    %18 = tpu.dynamic_rotate %12 by %c9_i32 dim 1 : vector<8x128xf32>, i32 -> vector<8x128xf32>
    %c1_i32 = arith.constant 1 : i32
    %19 = tpu.dynamic_rotate %12 by %c1_i32 dim 1 : vector<8x128xf32>, i32 -> vector<8x128xf32>
    %c127_i32 = arith.constant 127 : i32
    %20 = tpu.dynamic_rotate %12 by %c127_i32 dim 1 : vector<8x128xf32>, i32 -> vector<8x128xf32>
    %c119_i32 = arith.constant 119 : i32
    %21 = tpu.dynamic_rotate %12 by %c119_i32 dim 1 : vector<8x128xf32>, i32 -> vector<8x128xf32>
    %c118_i32 = arith.constant 118 : i32
    %22 = tpu.dynamic_rotate %12 by %c118_i32 dim 1 : vector<8x128xf32>, i32 -> vector<8x128xf32>
    %c117_i32 = arith.constant 117 : i32
    %23 = tpu.dynamic_rotate %12 by %c117_i32 dim 1 : vector<8x128xf32>, i32 -> vector<8x128xf32>
    %24 = tpu.concatenate %16, %17, %18, %19, %12, %20, %21, %22, %23 in 0 : vector<8x128xf32>, vector<8x128xf32>, vector<8x128xf32>, vector<8x128xf32>, vector<8x128xf32>, vector<8x128xf32>, vector<8x128xf32>, vector<8x128xf32>, vector<8x128xf32> -> vector<72x128xf32>
    %25 = arith.truncf %24 : vector<72x128xf32> to vector<72x128xbf16>
    %c0_11 = arith.constant 0 : index
    %c0_12 = arith.constant 0 : index
    %26 = vector.load %arg3[%c0_11, %c0_12] : memref<8x72xbf16, #tpu.memory_space<vmem>>, vector<8x72xbf16>
    %cst_13 = arith.constant dense<0.000000e+00> : vector<8x128xf32>
    %27 = tpu.matmul %26, %25, %cst_13 {dimension_numbers = #tpu.dot_dimension_numbers<[1], [0], [0], [1], [0, 0, 1, 1], [], []>} : vector<8x72xbf16>, vector<72x128xbf16>, vector<8x128xf32> -> vector<8x128xf32>
    %c0_14 = arith.constant 0 : index
    %c0_15 = arith.constant 0 : index
    %c0_16 = arith.constant 0 : index
    %28 = vector.load %arg6[%c0_14, %c0_15, %c0_16] : memref<1x8x128xf32, #tpu.memory_space<vmem>>, vector<1x8x128xf32>
    %29 = vector.shape_cast %28 : vector<1x8x128xf32> to vector<8x128xf32>
    %30 = vector.shape_cast %27 : vector<8x128xf32> to vector<1x8x128xf32>
    tpu.vector_store %arg6[%c0_14, %c0_15, %c0_16], %30 {strides = array<i32>} : memref<1x8x128xf32, #tpu.memory_space<vmem>>, vector<1x8x128xf32>,
    %31 = vector.broadcast %0 : vector<1x128xf32> to vector<8x128xf32>
    %32 = arith.mulf %27, %31 : vector<8x128xf32>
    %cst_17 = arith.constant dense<0.000000e+00> : vector<8xf32>
    %33 = vector.multi_reduction <add>, %32, %cst_17 [1] : vector<8x128xf32> to vector<8xf32>
    %34 = vector.shape_cast %33 : vector<8xf32> to vector<8x1xf32>
    %35 = arith.mulf %32, %32 : vector<8x128xf32>
    %cst_18 = arith.constant dense<0.000000e+00> : vector<8xf32>
    %36 = vector.multi_reduction <add>, %35, %cst_18 [1] : vector<8x128xf32> to vector<8xf32>
    %37 = vector.shape_cast %36 : vector<8xf32> to vector<8x1xf32>
    %38 = tpu.concatenate %34, %37 in 1 : vector<8x1xf32>, vector<8x1xf32> -> vector<8x2xf32>
    %c0_19 = arith.constant 0 : index
    %c0_20 = arith.constant 0 : index
    %c0_21 = arith.constant 0 : index
    %39 = vector.load %arg7[%c0_19, %c0_20, %c0_21] : memref<1x8x2xf32, #tpu.memory_space<vmem>>, vector<1x8x2xf32>
    %40 = vector.shape_cast %39 : vector<1x8x2xf32> to vector<8x2xf32>
    %41 = vector.shape_cast %38 : vector<8x2xf32> to vector<1x8x2xf32>
    tpu.vector_store %arg7[%c0_19, %c0_20, %c0_21], %41 {strides = array<i32>} : memref<1x8x2xf32, #tpu.memory_space<vmem>>, vector<1x8x2xf32>,
    return
  }
  func.func @transform_0(%arg0: i32) -> (i32, i32) {
    %c0_i32 = arith.constant 0 : i32
    %c0_i32_0 = arith.constant 0 : i32
    %c0_i32_1 = arith.constant 0 : i32
    return %c0_i32, %c0_i32_0 : i32, i32
  }
  func.func @transform_1(%arg0: i32) -> (i32, i32, i32) {
    %c0_i32 = arith.constant 0 : i32
    %c0_i32_0 = arith.constant 0 : i32
    %c0_i32_1 = arith.constant 0 : i32
    return %arg0, %c0_i32, %c0_i32_0 : i32, i32, i32
  }
  func.func @transform_2(%arg0: i32) -> (i32, i32) {
    %c0_i32 = arith.constant 0 : i32
    %c0_i32_0 = arith.constant 0 : i32
    %c0_i32_1 = arith.constant 0 : i32
    return %c0_i32, %c0_i32_0 : i32, i32
  }
  func.func @transform_3(%arg0: i32) -> (i32, i32) {
    %c0_i32 = arith.constant 0 : i32
    %c0_i32_0 = arith.constant 0 : i32
    %c0_i32_1 = arith.constant 0 : i32
    return %c0_i32, %c0_i32_0 : i32, i32
  }
  func.func @transform_4(%arg0: i32) -> (i32, i32) {
    %c0_i32 = arith.constant 0 : i32
    %c0_i32_0 = arith.constant 0 : i32
    %c0_i32_1 = arith.constant 0 : i32
    return %c0_i32, %c0_i32_0 : i32, i32
  }
  func.func @transform_5(%arg0: i32) -> (i32, i32, i32) {
    %c0_i32 = arith.constant 0 : i32
    %c0_i32_0 = arith.constant 0 : i32
    %c0_i32_1 = arith.constant 0 : i32
    return %arg0, %c0_i32, %c0_i32_0 : i32, i32, i32
  }
  func.func @transform_6(%arg0: i32) -> (i32, i32, i32) {
    %c0_i32 = arith.constant 0 : i32
    %c0_i32_0 = arith.constant 0 : i32
    %c0_i32_1 = arith.constant 0 : i32
    return %arg0, %c0_i32, %c0_i32_0 : i32, i32, i32
  }
  func.func @transform_7(%arg0: i32) -> (i32, i32, i32) {
    %c0_i32 = arith.constant 0 : i32
    %c0_i32_0 = arith.constant 0 : i32
    %c0_i32_1 = arith.constant 0 : i32
    return %arg0, %c0_i32, %c0_i32_0 : i32, i32, i32
  }
}

module attributes {stable_mosaic.version = 11 : i64} {
  func.func @kernel(%arg0: i32, %arg1: memref<1x128xf32, #tpu.memory_space<vmem>>, %arg2: memref<1x4x128xf32, #tpu.memory_space<vmem>>, %arg3: memref<8x36xbf16, #tpu.memory_space<vmem>>, %arg4: memref<1x8x128xf32, #tpu.memory_space<vmem>>, %arg5: memref<1x8x2xf32, #tpu.memory_space<vmem>>) attributes {dimension_semantics = [#tpu.dimension_semantics<parallel>], iteration_bounds = array<i64: 2>, scalar_prefetch = 0 : i64, scratch_operands = 0 : i64, tpu.core_type = #tpu.core_type<tc>, window_params = [{pipeline_mode = #tpu.pipeline_mode<synchronous>, transform_indices = @transform_0, window_bounds = array<i64: 1, 128>}, {transform_indices = @transform_1, window_bounds = array<i64: 1, 4, 128>}, {pipeline_mode = #tpu.pipeline_mode<synchronous>, transform_indices = @transform_2, window_bounds = array<i64: 8, 36>}, {transform_indices = @transform_3, window_bounds = array<i64: 1, 8, 128>}, {transform_indices = @transform_4, window_bounds = array<i64: 1, 8, 2>}]} {
    %c0 = arith.constant 0 : index
    %c0_0 = arith.constant 0 : index
    %0 = vector.load %arg1[%c0, %c0_0] : memref<1x128xf32, #tpu.memory_space<vmem>>, vector<1x128xf32>
    %c0_1 = arith.constant 0 : index
    %c0_2 = arith.constant 0 : index
    %c0_3 = arith.constant 0 : index
    %1 = vector.load %arg2[%c0_1, %c0_2, %c0_3] : memref<1x4x128xf32, #tpu.memory_space<vmem>>, vector<1x4x128xf32>
    %2 = vector.shape_cast %1 : vector<1x4x128xf32> to vector<4x128xf32>
    %c11_i32 = arith.constant 11 : i32
    %3 = tpu.dynamic_rotate %2 by %c11_i32 dim 1 : vector<4x128xf32>, i32 -> vector<4x128xf32>
    %c10_i32 = arith.constant 10 : i32
    %4 = tpu.dynamic_rotate %2 by %c10_i32 dim 1 : vector<4x128xf32>, i32 -> vector<4x128xf32>
    %c9_i32 = arith.constant 9 : i32
    %5 = tpu.dynamic_rotate %2 by %c9_i32 dim 1 : vector<4x128xf32>, i32 -> vector<4x128xf32>
    %c1_i32 = arith.constant 1 : i32
    %6 = tpu.dynamic_rotate %2 by %c1_i32 dim 1 : vector<4x128xf32>, i32 -> vector<4x128xf32>
    %c127_i32 = arith.constant 127 : i32
    %7 = tpu.dynamic_rotate %2 by %c127_i32 dim 1 : vector<4x128xf32>, i32 -> vector<4x128xf32>
    %c119_i32 = arith.constant 119 : i32
    %8 = tpu.dynamic_rotate %2 by %c119_i32 dim 1 : vector<4x128xf32>, i32 -> vector<4x128xf32>
    %c118_i32 = arith.constant 118 : i32
    %9 = tpu.dynamic_rotate %2 by %c118_i32 dim 1 : vector<4x128xf32>, i32 -> vector<4x128xf32>
    %c117_i32 = arith.constant 117 : i32
    %10 = tpu.dynamic_rotate %2 by %c117_i32 dim 1 : vector<4x128xf32>, i32 -> vector<4x128xf32>
    %11 = tpu.concatenate %3, %4, %5, %6, %2, %7, %8, %9, %10 in 0 : vector<4x128xf32>, vector<4x128xf32>, vector<4x128xf32>, vector<4x128xf32>, vector<4x128xf32>, vector<4x128xf32>, vector<4x128xf32>, vector<4x128xf32>, vector<4x128xf32> -> vector<36x128xf32>
    %12 = arith.truncf %11 : vector<36x128xf32> to vector<36x128xbf16>
    %c0_4 = arith.constant 0 : index
    %c0_5 = arith.constant 0 : index
    %13 = vector.load %arg3[%c0_4, %c0_5] : memref<8x36xbf16, #tpu.memory_space<vmem>>, vector<8x36xbf16>
    %cst = arith.constant dense<0.000000e+00> : vector<8x128xf32>
    %14 = tpu.matmul %13, %12, %cst {dimension_numbers = #tpu.dot_dimension_numbers<[1], [0], [0], [1], [0, 0, 1, 1], [], []>} : vector<8x36xbf16>, vector<36x128xbf16>, vector<8x128xf32> -> vector<8x128xf32>
    %c0_6 = arith.constant 0 : index
    %c0_7 = arith.constant 0 : index
    %c0_8 = arith.constant 0 : index
    %15 = vector.load %arg4[%c0_6, %c0_7, %c0_8] : memref<1x8x128xf32, #tpu.memory_space<vmem>>, vector<1x8x128xf32>
    %16 = vector.shape_cast %15 : vector<1x8x128xf32> to vector<8x128xf32>
    %17 = vector.shape_cast %14 : vector<8x128xf32> to vector<1x8x128xf32>
    tpu.vector_store %arg4[%c0_6, %c0_7, %c0_8], %17 {strides = array<i32>} : memref<1x8x128xf32, #tpu.memory_space<vmem>>, vector<1x8x128xf32>,
    %18 = vector.broadcast %0 : vector<1x128xf32> to vector<8x128xf32>
    %19 = arith.mulf %14, %18 : vector<8x128xf32>
    %cst_9 = arith.constant dense<0.000000e+00> : vector<8xf32>
    %20 = vector.multi_reduction <add>, %19, %cst_9 [1] : vector<8x128xf32> to vector<8xf32>
    %21 = vector.shape_cast %20 : vector<8xf32> to vector<8x1xf32>
    %22 = arith.mulf %19, %19 : vector<8x128xf32>
    %cst_10 = arith.constant dense<0.000000e+00> : vector<8xf32>
    %23 = vector.multi_reduction <add>, %22, %cst_10 [1] : vector<8x128xf32> to vector<8xf32>
    %24 = vector.shape_cast %23 : vector<8xf32> to vector<8x1xf32>
    %25 = tpu.concatenate %21, %24 in 1 : vector<8x1xf32>, vector<8x1xf32> -> vector<8x2xf32>
    %c0_11 = arith.constant 0 : index
    %c0_12 = arith.constant 0 : index
    %c0_13 = arith.constant 0 : index
    %26 = vector.load %arg5[%c0_11, %c0_12, %c0_13] : memref<1x8x2xf32, #tpu.memory_space<vmem>>, vector<1x8x2xf32>
    %27 = vector.shape_cast %26 : vector<1x8x2xf32> to vector<8x2xf32>
    %28 = vector.shape_cast %25 : vector<8x2xf32> to vector<1x8x2xf32>
    tpu.vector_store %arg5[%c0_11, %c0_12, %c0_13], %28 {strides = array<i32>} : memref<1x8x2xf32, #tpu.memory_space<vmem>>, vector<1x8x2xf32>,
    return
  }
  func.func @transform_0(%arg0: i32) -> (i32, i32) {
    %c0_i32 = arith.constant 0 : i32
    %c0_i32_0 = arith.constant 0 : i32
    %c0_i32_1 = arith.constant 0 : i32
    return %c0_i32, %c0_i32_0 : i32, i32
  }
  func.func @transform_1(%arg0: i32) -> (i32, i32, i32) {
    %c0_i32 = arith.constant 0 : i32
    %c0_i32_0 = arith.constant 0 : i32
    %c0_i32_1 = arith.constant 0 : i32
    return %arg0, %c0_i32, %c0_i32_0 : i32, i32, i32
  }
  func.func @transform_2(%arg0: i32) -> (i32, i32) {
    %c0_i32 = arith.constant 0 : i32
    %c0_i32_0 = arith.constant 0 : i32
    %c0_i32_1 = arith.constant 0 : i32
    return %c0_i32, %c0_i32_0 : i32, i32
  }
  func.func @transform_3(%arg0: i32) -> (i32, i32, i32) {
    %c0_i32 = arith.constant 0 : i32
    %c0_i32_0 = arith.constant 0 : i32
    %c0_i32_1 = arith.constant 0 : i32
    return %arg0, %c0_i32, %c0_i32_0 : i32, i32, i32
  }
  func.func @transform_4(%arg0: i32) -> (i32, i32, i32) {
    %c0_i32 = arith.constant 0 : i32
    %c0_i32_0 = arith.constant 0 : i32
    %c0_i32_1 = arith.constant 0 : i32
    return %arg0, %c0_i32, %c0_i32_0 : i32, i32, i32
  }
}

module attributes {stable_mosaic.version = 11 : i64} {
  func.func @kernel(%arg0: i32, %arg1: memref<1x16xi32, #tpu.memory_space<vmem>>, %arg2: memref<1x8x16xf32, #tpu.memory_space<vmem>>, %arg3: memref<1x8x16xf32, #tpu.memory_space<vmem>>, %arg4: memref<1x8x16xf32, #tpu.memory_space<vmem>>, %arg5: memref<1x8x16xf32, #tpu.memory_space<vmem>>, %arg6: memref<8x1xf32, #tpu.memory_space<vmem>>, %arg7: memref<8x1xf32, #tpu.memory_space<vmem>>, %arg8: memref<1x8x16xf32, #tpu.memory_space<vmem>>, %arg9: memref<1x8x16xf32, #tpu.memory_space<vmem>>, %arg10: memref<1x8x16xf32, #tpu.memory_space<vmem>>, %arg11: memref<1x8x16xf32, #tpu.memory_space<vmem>>, %arg12: memref<1x8x16xf32, #tpu.memory_space<vmem>>, %arg13: memref<1x8x16xi32, #tpu.memory_space<vmem>>) attributes {dimension_semantics = [#tpu.dimension_semantics<parallel>], iteration_bounds = array<i64: 2>, scalar_prefetch = 0 : i64, scratch_operands = 0 : i64, tpu.core_type = #tpu.core_type<tc>, window_params = [{pipeline_mode = #tpu.pipeline_mode<synchronous>, transform_indices = @transform_0, window_bounds = array<i64: 1, 16>}, {transform_indices = @transform_1, window_bounds = array<i64: 1, 8, 16>}, {transform_indices = @transform_2, window_bounds = array<i64: 1, 8, 16>}, {transform_indices = @transform_3, window_bounds = array<i64: 1, 8, 16>}, {transform_indices = @transform_4, window_bounds = array<i64: 1, 8, 16>}, {pipeline_mode = #tpu.pipeline_mode<synchronous>, transform_indices = @transform_5, window_bounds = array<i64: 8, 1>}, {pipeline_mode = #tpu.pipeline_mode<synchronous>, transform_indices = @transform_6, window_bounds = array<i64: 8, 1>}, {transform_indices = @transform_7, window_bounds = array<i64: 1, 8, 16>}, {transform_indices = @transform_8, window_bounds = array<i64: 1, 8, 16>}, {transform_indices = @transform_9, window_bounds = array<i64: 1, 8, 16>}, {transform_indices = @transform_10, window_bounds = array<i64: 1, 8, 16>}, {transform_indices = @transform_11, window_bounds = array<i64: 1, 8, 16>}, {transform_indices = @transform_12, window_bounds = array<i64: 1, 8, 16>}]} {
    %c0 = arith.constant 0 : index
    %c0_0 = arith.constant 0 : index
    %0 = vector.load %arg6[%c0, %c0_0] : memref<8x1xf32, #tpu.memory_space<vmem>>, vector<8x1xf32>
    %c0_1 = arith.constant 0 : index
    %c0_2 = arith.constant 0 : index
    %1 = vector.load %arg7[%c0_1, %c0_2] : memref<8x1xf32, #tpu.memory_space<vmem>>, vector<8x1xf32>
    %c0_3 = arith.constant 0 : index
    %c0_4 = arith.constant 0 : index
    %2 = vector.load %arg1[%c0_3, %c0_4] : memref<1x16xi32, #tpu.memory_space<vmem>>, vector<1x16xi32>
    %c0_5 = arith.constant 0 : index
    %c0_6 = arith.constant 0 : index
    %c0_7 = arith.constant 0 : index
    %3 = vector.load %arg2[%c0_5, %c0_6, %c0_7] : memref<1x8x16xf32, #tpu.memory_space<vmem>>, vector<1x8x16xf32>
    %4 = vector.shape_cast %3 : vector<1x8x16xf32> to vector<8x16xf32>
    %5 = vector.broadcast %0 : vector<8x1xf32> to vector<8x16xf32>
    %6 = arith.mulf %4, %5 : vector<8x16xf32>
    %7 = vector.broadcast %1 : vector<8x1xf32> to vector<8x16xf32>
    %8 = arith.addf %6, %7 : vector<8x16xf32>
    %cst = arith.constant 0.000000e+00 : f32
    %9 = vector.broadcast %cst : f32 to vector<8x16xf32>
    %10 = arith.maximumf %8, %9 : vector<8x16xf32>
    %c0_8 = arith.constant 0 : index
    %c0_9 = arith.constant 0 : index
    %c0_10 = arith.constant 0 : index
    %11 = vector.load %arg8[%c0_8, %c0_9, %c0_10] : memref<1x8x16xf32, #tpu.memory_space<vmem>>, vector<1x8x16xf32>
    %12 = vector.shape_cast %11 : vector<1x8x16xf32> to vector<8x16xf32>
    %13 = vector.shape_cast %10 : vector<8x16xf32> to vector<1x8x16xf32>
    tpu.vector_store %arg8[%c0_8, %c0_9, %c0_10], %13 {strides = array<i32>} : memref<1x8x16xf32, #tpu.memory_space<vmem>>, vector<1x8x16xf32>,
    %c0_11 = arith.constant 0 : index
    %c0_12 = arith.constant 0 : index
    %c0_13 = arith.constant 0 : index
    %14 = vector.load %arg3[%c0_11, %c0_12, %c0_13] : memref<1x8x16xf32, #tpu.memory_space<vmem>>, vector<1x8x16xf32>
    %15 = vector.shape_cast %14 : vector<1x8x16xf32> to vector<8x16xf32>
    %16 = vector.broadcast %0 : vector<8x1xf32> to vector<8x16xf32>
    %17 = arith.mulf %15, %16 : vector<8x16xf32>
    %18 = vector.broadcast %1 : vector<8x1xf32> to vector<8x16xf32>
    %19 = arith.addf %17, %18 : vector<8x16xf32>
    %cst_14 = arith.constant 0.000000e+00 : f32
    %20 = vector.broadcast %cst_14 : f32 to vector<8x16xf32>
    %21 = arith.maximumf %19, %20 : vector<8x16xf32>
    %c0_15 = arith.constant 0 : index
    %c0_16 = arith.constant 0 : index
    %c0_17 = arith.constant 0 : index
    %22 = vector.load %arg9[%c0_15, %c0_16, %c0_17] : memref<1x8x16xf32, #tpu.memory_space<vmem>>, vector<1x8x16xf32>
    %23 = vector.shape_cast %22 : vector<1x8x16xf32> to vector<8x16xf32>
    %24 = vector.shape_cast %21 : vector<8x16xf32> to vector<1x8x16xf32>
    tpu.vector_store %arg9[%c0_15, %c0_16, %c0_17], %24 {strides = array<i32>} : memref<1x8x16xf32, #tpu.memory_space<vmem>>, vector<1x8x16xf32>,
    %c0_18 = arith.constant 0 : index
    %c0_19 = arith.constant 0 : index
    %c0_20 = arith.constant 0 : index
    %25 = vector.load %arg4[%c0_18, %c0_19, %c0_20] : memref<1x8x16xf32, #tpu.memory_space<vmem>>, vector<1x8x16xf32>
    %26 = vector.shape_cast %25 : vector<1x8x16xf32> to vector<8x16xf32>
    %27 = vector.broadcast %0 : vector<8x1xf32> to vector<8x16xf32>
    %28 = arith.mulf %26, %27 : vector<8x16xf32>
    %29 = vector.broadcast %1 : vector<8x1xf32> to vector<8x16xf32>
    %30 = arith.addf %28, %29 : vector<8x16xf32>
    %cst_21 = arith.constant 0.000000e+00 : f32
    %31 = vector.broadcast %cst_21 : f32 to vector<8x16xf32>
    %32 = arith.maximumf %30, %31 : vector<8x16xf32>
    %c0_22 = arith.constant 0 : index
    %c0_23 = arith.constant 0 : index
    %c0_24 = arith.constant 0 : index
    %33 = vector.load %arg10[%c0_22, %c0_23, %c0_24] : memref<1x8x16xf32, #tpu.memory_space<vmem>>, vector<1x8x16xf32>
    %34 = vector.shape_cast %33 : vector<1x8x16xf32> to vector<8x16xf32>
    %35 = vector.shape_cast %32 : vector<8x16xf32> to vector<1x8x16xf32>
    tpu.vector_store %arg10[%c0_22, %c0_23, %c0_24], %35 {strides = array<i32>} : memref<1x8x16xf32, #tpu.memory_space<vmem>>, vector<1x8x16xf32>,
    %c0_25 = arith.constant 0 : index
    %c0_26 = arith.constant 0 : index
    %c0_27 = arith.constant 0 : index
    %36 = vector.load %arg5[%c0_25, %c0_26, %c0_27] : memref<1x8x16xf32, #tpu.memory_space<vmem>>, vector<1x8x16xf32>
    %37 = vector.shape_cast %36 : vector<1x8x16xf32> to vector<8x16xf32>
    %38 = vector.broadcast %0 : vector<8x1xf32> to vector<8x16xf32>
    %39 = arith.mulf %37, %38 : vector<8x16xf32>
    %40 = vector.broadcast %1 : vector<8x1xf32> to vector<8x16xf32>
    %41 = arith.addf %39, %40 : vector<8x16xf32>
    %cst_28 = arith.constant 0.000000e+00 : f32
    %42 = vector.broadcast %cst_28 : f32 to vector<8x16xf32>
    %43 = arith.maximumf %41, %42 : vector<8x16xf32>
    %c0_29 = arith.constant 0 : index
    %c0_30 = arith.constant 0 : index
    %c0_31 = arith.constant 0 : index
    %44 = vector.load %arg11[%c0_29, %c0_30, %c0_31] : memref<1x8x16xf32, #tpu.memory_space<vmem>>, vector<1x8x16xf32>
    %45 = vector.shape_cast %44 : vector<1x8x16xf32> to vector<8x16xf32>
    %46 = vector.shape_cast %43 : vector<8x16xf32> to vector<1x8x16xf32>
    tpu.vector_store %arg11[%c0_29, %c0_30, %c0_31], %46 {strides = array<i32>} : memref<1x8x16xf32, #tpu.memory_space<vmem>>, vector<1x8x16xf32>,
    %c0_i32 = arith.constant 0 : i32
    %47 = vector.broadcast %c0_i32 : i32 to vector<1x16xi32>
    %48 = arith.addi %2, %47 : vector<1x16xi32>
    %49 = vector.shape_cast %48 : vector<1x16xi32> to vector<1x16xi32>
    %50 = vector.broadcast %49 : vector<1x16xi32> to vector<8x16xi32>
    %51 = arith.cmpf ogt, %21, %10 : vector<8x16xf32>
    %c1_i32 = arith.constant 1 : i32
    %52 = vector.broadcast %c1_i32 : i32 to vector<1x16xi32>
    %53 = arith.addi %2, %52 : vector<1x16xi32>
    %54 = vector.shape_cast %53 : vector<1x16xi32> to vector<1x16xi32>
    %55 = vector.broadcast %54 : vector<1x16xi32> to vector<8x16xi32>
    %56 = arith.select %51, %55, %50 : vector<8x16xi1>, vector<8x16xi32>
    %57 = arith.select %51, %21, %10 : vector<8x16xi1>, vector<8x16xf32>
    %58 = arith.cmpf ogt, %32, %57 : vector<8x16xf32>
    %c8_i32 = arith.constant 8 : i32
    %59 = vector.broadcast %c8_i32 : i32 to vector<1x16xi32>
    %60 = arith.addi %2, %59 : vector<1x16xi32>
    %61 = vector.shape_cast %60 : vector<1x16xi32> to vector<1x16xi32>
    %62 = vector.broadcast %61 : vector<1x16xi32> to vector<8x16xi32>
    %63 = arith.select %58, %62, %56 : vector<8x16xi1>, vector<8x16xi32>
    %64 = arith.select %58, %32, %57 : vector<8x16xi1>, vector<8x16xf32>
    %65 = arith.cmpf ogt, %43, %64 : vector<8x16xf32>
    %c9_i32 = arith.constant 9 : i32
    %66 = vector.broadcast %c9_i32 : i32 to vector<1x16xi32>
    %67 = arith.addi %2, %66 : vector<1x16xi32>
    %68 = vector.shape_cast %67 : vector<1x16xi32> to vector<1x16xi32>
    %69 = vector.broadcast %68 : vector<1x16xi32> to vector<8x16xi32>
    %70 = arith.select %65, %69, %63 : vector<8x16xi1>, vector<8x16xi32>
    %71 = arith.select %65, %43, %64 : vector<8x16xi1>, vector<8x16xf32>
    %c0_32 = arith.constant 0 : index
    %c0_33 = arith.constant 0 : index
    %c0_34 = arith.constant 0 : index
    %72 = vector.load %arg12[%c0_32, %c0_33, %c0_34] : memref<1x8x16xf32, #tpu.memory_space<vmem>>, vector<1x8x16xf32>
    %73 = vector.shape_cast %72 : vector<1x8x16xf32> to vector<8x16xf32>
    %74 = vector.shape_cast %71 : vector<8x16xf32> to vector<1x8x16xf32>
    tpu.vector_store %arg12[%c0_32, %c0_33, %c0_34], %74 {strides = array<i32>} : memref<1x8x16xf32, #tpu.memory_space<vmem>>, vector<1x8x16xf32>,
    %c0_35 = arith.constant 0 : index
    %c0_36 = arith.constant 0 : index
    %c0_37 = arith.constant 0 : index
    %75 = vector.load %arg13[%c0_35, %c0_36, %c0_37] : memref<1x8x16xi32, #tpu.memory_space<vmem>>, vector<1x8x16xi32>
    %76 = vector.shape_cast %75 : vector<1x8x16xi32> to vector<8x16xi32>
    %77 = vector.shape_cast %70 : vector<8x16xi32> to vector<1x8x16xi32>
    tpu.vector_store %arg13[%c0_35, %c0_36, %c0_37], %77 {strides = array<i32>} : memref<1x8x16xi32, #tpu.memory_space<vmem>>, vector<1x8x16xi32>,
    return
  }
  func.func @transform_0(%arg0: i32) -> (i32, i32) {
    %c0_i32 = arith.constant 0 : i32
    %c0_i32_0 = arith.constant 0 : i32
    %c0_i32_1 = arith.constant 0 : i32
    return %c0_i32, %c0_i32_0 : i32, i32
  }
  func.func @transform_1(%arg0: i32) -> (i32, i32, i32) {
    %c0_i32 = arith.constant 0 : i32
    %c0_i32_0 = arith.constant 0 : i32
    %c0_i32_1 = arith.constant 0 : i32
    return %arg0, %c0_i32, %c0_i32_0 : i32, i32, i32
  }
  func.func @transform_2(%arg0: i32) -> (i32, i32, i32) {
    %c0_i32 = arith.constant 0 : i32
    %c0_i32_0 = arith.constant 0 : i32
    %c0_i32_1 = arith.constant 0 : i32
    return %arg0, %c0_i32, %c0_i32_0 : i32, i32, i32
  }
  func.func @transform_3(%arg0: i32) -> (i32, i32, i32) {
    %c0_i32 = arith.constant 0 : i32
    %c0_i32_0 = arith.constant 0 : i32
    %c0_i32_1 = arith.constant 0 : i32
    return %arg0, %c0_i32, %c0_i32_0 : i32, i32, i32
  }
  func.func @transform_4(%arg0: i32) -> (i32, i32, i32) {
    %c0_i32 = arith.constant 0 : i32
    %c0_i32_0 = arith.constant 0 : i32
    %c0_i32_1 = arith.constant 0 : i32
    return %arg0, %c0_i32, %c0_i32_0 : i32, i32, i32
  }
  func.func @transform_5(%arg0: i32) -> (i32, i32) {
    %c0_i32 = arith.constant 0 : i32
    %c0_i32_0 = arith.constant 0 : i32
    %c0_i32_1 = arith.constant 0 : i32
    return %c0_i32, %c0_i32_0 : i32, i32
  }
  func.func @transform_6(%arg0: i32) -> (i32, i32) {
    %c0_i32 = arith.constant 0 : i32
    %c0_i32_0 = arith.constant 0 : i32
    %c0_i32_1 = arith.constant 0 : i32
    return %c0_i32, %c0_i32_0 : i32, i32
  }
  func.func @transform_7(%arg0: i32) -> (i32, i32, i32) {
    %c0_i32 = arith.constant 0 : i32
    %c0_i32_0 = arith.constant 0 : i32
    %c0_i32_1 = arith.constant 0 : i32
    return %arg0, %c0_i32, %c0_i32_0 : i32, i32, i32
  }
  func.func @transform_8(%arg0: i32) -> (i32, i32, i32) {
    %c0_i32 = arith.constant 0 : i32
    %c0_i32_0 = arith.constant 0 : i32
    %c0_i32_1 = arith.constant 0 : i32
    return %arg0, %c0_i32, %c0_i32_0 : i32, i32, i32
  }
  func.func @transform_9(%arg0: i32) -> (i32, i32, i32) {
    %c0_i32 = arith.constant 0 : i32
    %c0_i32_0 = arith.constant 0 : i32
    %c0_i32_1 = arith.constant 0 : i32
    return %arg0, %c0_i32, %c0_i32_0 : i32, i32, i32
  }
  func.func @transform_10(%arg0: i32) -> (i32, i32, i32) {
    %c0_i32 = arith.constant 0 : i32
    %c0_i32_0 = arith.constant 0 : i32
    %c0_i32_1 = arith.constant 0 : i32
    return %arg0, %c0_i32, %c0_i32_0 : i32, i32, i32
  }
  func.func @transform_11(%arg0: i32) -> (i32, i32, i32) {
    %c0_i32 = arith.constant 0 : i32
    %c0_i32_0 = arith.constant 0 : i32
    %c0_i32_1 = arith.constant 0 : i32
    return %arg0, %c0_i32, %c0_i32_0 : i32, i32, i32
  }
  func.func @transform_12(%arg0: i32) -> (i32, i32, i32) {
    %c0_i32 = arith.constant 0 : i32
    %c0_i32_0 = arith.constant 0 : i32
    %c0_i32_1 = arith.constant 0 : i32
    return %arg0, %c0_i32, %c0_i32_0 : i32, i32, i32
  }
}

</mosaic_0001>

<bundles_post_ra>
// kernel: encoder_sh_forward.6
= control target key start
LH: loop header
LB: loop body
LE: loop exit
PB: predicated region body
PF: predicated region fallthrough
CT: control target
= control target key end

     0   :  { %s752_s15 = smov 0   ;;  %s902_s0 = inlined_call_operand.vmem [shape: f32[1,384], index: 0, kind: input, shape index: {}]   ;;  %s903_s1 = inlined_call_operand.vmem [shape: f32[2,3,384], index: 1, kind: input, shape index: {}]   ;;  %s904_s2 = inlined_call_operand.vmem [shape: bf16[4,27], index: 2, kind: input, shape index: {}]   ;;  %s905_s3 = inlined_call_operand.vmem [shape: f32[2,4,384], index: 3, kind: output, shape index: {0}]   ;;  %s906_s4 = inlined_call_operand.vmem [shape: f32[2,4,2], index: 4, kind: output, shape index: {1}]  }
   0x1 LB: > { %s620_s16 = sadd.s32 4294967295, %s713_s15   ;;  %p624_p0 = scmp.ge.s32.totalorder %s713_s15, 1  ;;  %s713_s15 = sphi %s752_s15, %s15_s15  }
   0x2   : > { %p165_p1 = scmp.lt.s32.totalorder %s713_s15, 3 }
   0x4   : > { %p166_p2 = pnand %p624_p0, %p165_p1 }
   0x5   : > { %p195_p3 = scmp.lt.s32.totalorder (!%p166_p2), %s620_s16, 1  ;;  %s715_s21 = smov (!%p166_p2), 1   ;;  %v720_v5 = vmov (!%p166_p2), 0.0   ;;  %v723_v6 = vmov (!%p166_p2), 0   ;;  %vm724_vm0 = vmmov (!%p166_p2), 0   ;;  %v223_v7 = vlaneseq (!%p166_p2) }
   0x6   : > { %169 = sbr.rel (%p166_p2) target bundleno = 538 (0x21a), region = 32  ;;  %s716_s22 = smov (!%p166_p2), 17   ;;  %635 = vmatprep.subr.bf16.mxu1 (!%p166_p2), %v720_v5  ;;  %439 = vmatprep.mubr.bf16.mxu0 (!%p166_p2), %v723_v6  ;;  %vm365_vm5 = vcmask (!%p166_p2), 1040384   ;;  %vm357_vm7 = vcmask (!%p166_p2), 1042432   ;;  %vm361_vm9 = vcmask (!%p166_p2), 1045504   ;;  %vm369_vm10 = vcmask (!%p166_p2), 1043456  }
   0x7   : > { %s717_s23 = smov (!%p166_p2), 18   ;;  %s718_s24 = smov (!%p166_p2), 19   ;;  %639 = vmatprep.mubr.msk.bf16.mxu1 (!%p166_p2), %vm724_vm0, %v720_v5  ;;  %v787_v10 = vand.u32 (!%p166_p2), 127, %v223_v7  ;;  %vm373_vm11 = vcmask (!%p166_p2), 1046528   ;;  %vm377_vm13 = vcmask (!%p166_p2), 1041408   ;;  %vm381_vm15 = vcmask (!%p166_p2), 1044480  }
   0x8   : > { %s719_s25 = smov (!%p166_p2), 127   ;;  %s721_s26 = smov (!%p166_p2), 111   ;;  %vm392_vm0 = vcmask (!%p166_p2), 220160  }
   0x9   : > { %s722_s27 = smov (!%p166_p2), 110   ;;  %s725_s28 = smov (!%p166_p2), 109   ;;  %vm245_vm1 = vcmp.lt.s32.totalorder (!%p166_p2), %v787_v10, 17  ;;  %vm235_vm2 = vcmp.lt.s32.totalorder (!%p166_p2), %v787_v10, 18  ;;  %vm255_vm3 = vcmp.lt.s32.totalorder (!%p166_p2), %v787_v10, 1  ;;  %vm265_vm4 = vcmp.lt.s32.totalorder (!%p166_p2), %v787_v10, 127 }
   0xa   : > { %vm225_vm6 = vcmp.lt.s32.totalorder (!%p166_p2), %v787_v10, 19  ;;  %vm275_vm8 = vcmp.lt.s32.totalorder (!%p166_p2), %v787_v10, 111  ;;  %vm285_vm12 = vcmp.lt.s32.totalorder (!%p166_p2), %v787_v10, 110  ;;  %vm295_vm14 = vcmp.lt.s32.totalorder (!%p166_p2), %v787_v10, 109 }
   0xb   : > { %v496_v10 = vshrl.u32 (!%p166_p2), %v223_v7, 7 }
   0xd   : > { %s908_s16 = smov (!%p195_p3, %s620_s16), 1 }
   0xe   : > { %s643_s17 = smul.u32 12, %s908_s16  ;;  %s627_s10 = sshll.u32 %s908_s16, 2 }
   0xf   : > { %s208_s13 = scalar_lea.vmem %s906_s4, %s627_s10 }
  0x10   : > { %s199_s20 = scalar_lea.vmem %s903_s1, %s643_s17  ;;  %s204_s9 = scalar_lea.vmem %s905_s3, %s643_s17 }
  0x11   : > { %v768_v0 = vld [vmem:[%s199_s20 + $0x8] sm:$0x7]  ;;  %v770_v1 = vld [vmem:[%s199_s20] sm:$0x77] }
  0x12   : > { %253 = vrot.lane.b32.xlu0 %v768_v0, %s715_s21  ;;  %243 = vrot.lane.b32.xlu1 %v768_v0, %s716_s22  ;;  %v215_v2 = vcombine.high %v770_v1, %v770_v1  ;;  %v326_v23 = vcombine.low %v770_v1, %v770_v1  ;;  %v327_v24 = vcombine.low %v768_v0, %v768_v0 }
  0x14   : > { %v664_v3 = vpack.i.bf16 %v215_v2, %v770_v1  ;;  %v679_v4 = vpack.i.bf16 %v768_v0, %v215_v2 }
  0x16   : > { %233 = vrot.lane.b32.xlu1 %v768_v0, %s717_s23  ;;  %665 = vrot.lane.b32.xlu0 %v664_v3, %s716_s22 }
  0x1a   : > { %675 = vrot.lane.b32.xlu1 %v664_v3, %s717_s23  ;;  %670 = vrot.lane.b32.xlu0 %v664_v3, %s715_s21 }
  0x1e   : > { %685 = vrot.lane.b32.xlu1 %v664_v3, %s718_s24  ;;  %680 = vrot.lane.b32.xlu0 %v679_v4, %s719_s25 }
  0x22   : > { %690 = vrot.lane.b32.xlu1 %v679_v4, %s721_s26  ;;  %259 = vrot.lane.b32.xlu0 %v770_v1, %s719_s25 }
  0x26   : > { %269 = vrot.lane.b32.xlu1 %v770_v1, %s721_s26  ;;  %221 = vrot.lane.b32.xlu0 %v768_v0, %s718_s24 }
  0x2a   : > { %695 = vrot.lane.b32.xlu0 %v679_v4, %s722_s27  ;;  %279 = vrot.lane.b32.xlu1 %v770_v1, %s722_s27 }
  0x2e   : > { %700 = vrot.lane.b32.xlu0 %v679_v4, %s725_s28  ;;  %289 = vrot.lane.b32.xlu1 %v770_v1, %s725_s28 }
  0x84   : > { %v254_v8 = vpop.permute.xlu0 %253  ;;  %v244_v9 = vpop.permute.xlu1 %243 }
  0x88   : > { %v234_v11 = vpop.permute.xlu1 %233  ;;  %v666_v12 = vpop.permute.xlu0 %665 }
  0x89   : > { %v668_v13 = vunpack.i.h.bf16 %v666_v12  ;;  %v667_v14 = vunpack.i.l.bf16 %v666_v12 }
  0x8b   : > { %v795_v15 = vsel %vm245_vm1, %v244_v9, %v667_v14  ;;  %v247_v18 = vsel %vm245_vm1, %v667_v14, %v668_v13  ;;  %v246_v25 = vsel %vm245_vm1, %v668_v13, %v244_v9  ;;  %vm530_vm1 = vcmask 7168  }
  0x8c   : > { %v676_v16 = vpop.permute.xlu1 %675  ;;  %v671_v17 = vpop.permute.xlu0 %670  ;;  %v311_v28 = vrot.slane %v795_v15, 2  ;;  %v312_v33 = vrot.slane %v247_v18, 2  ;;  %v313_v42 = vrot.slane %v246_v25, 2 }
  0x8d   : > { %v678_v19 = vunpack.i.h.bf16 %v676_v16  ;;  %v677_v20 = vunpack.i.l.bf16 %v676_v16  ;;  %v673_v21 = vunpack.i.h.bf16 %v671_v17  ;;  %v672_v22 = vunpack.i.l.bf16 %v671_v17 }
  0x8f   : > { %v237_v26 = vsel %vm235_vm2, %v677_v20, %v678_v19  ;;  %v256_v27 = vsel %vm255_vm3, %v673_v21, %v254_v8  ;;  %v257_v34 = vsel %vm255_vm3, %v672_v22, %v673_v21  ;;  %v258_v35 = vsel %vm255_vm3, %v254_v8, %v672_v22 }
  0x90   : > { %v303_v29 = vrot.slane %v237_v26, 5  ;;  %v322_v30 = vrot.slane %v256_v27, 7  ;;  %v686_v31 = vpop.permute.xlu1 %685  ;;  %v681_v32 = vpop.permute.xlu0 %680  ;;  %v320_v38 = vrot.slane %v258_v35, 7  ;;  %v321_v39 = vrot.slane %v257_v34, 7 }
  0x91   : > { %v688_v36 = vunpack.i.h.bf16 %v686_v31  ;;  %v687_v37 = vunpack.i.l.bf16 %v686_v31  ;;  %v683_v40 = vunpack.i.h.bf16 %v681_v32  ;;  %v682_v41 = vunpack.i.l.bf16 %v681_v32 }
  0x92   : > { %v236_v43 = vsel %vm235_vm2, %v678_v19, %v234_v11  ;;  %v238_v44 = vsel %vm235_vm2, %v234_v11, %v677_v20  ;;  %v367_v50 = vsel %vm365_vm5, %v312_v33, %v321_v39  ;;  %v366_v51 = vsel %vm365_vm5, %v311_v28, %v320_v38 }
  0x93   : > { %v227_v45 = vsel %vm225_vm6, %v687_v37, %v688_v36  ;;  %v266_v48 = vsel %vm265_vm4, %v682_v41, %v683_v40  ;;  %v368_v58 = vsel %vm365_vm5, %v313_v42, %v322_v30  ;;  %v304_v59 = vrot.slane %v236_v43, 5 }
  0x94   : > { %v691_v46 = vpop.permute.xlu1 %690  ;;  %v260_v47 = vpop.permute.xlu0 %259  ;;  %v359_v49 = vsel %vm357_vm7, %v227_v45, %v303_v29  ;;  %v334_v57 = vrot.slane %v266_v48, 1  ;;  %v302_v60 = vrot.slane %v238_v44, 5  ;;  %v371_v62 = vsel %vm369_vm10, %v367_v50, %v770_v1 }
  0x95   : > { %v693_v52 = vunpack.i.h.bf16 %v691_v46  ;;  %v692_v53 = vunpack.i.l.bf16 %v691_v46  ;;  %v267_v54 = vsel %vm265_vm4, %v260_v47, %v682_v41  ;;  %v268_v55 = vsel %vm265_vm4, %v683_v40, %v260_v47 }
  0x96   : > { %v333_v56 = vrot.slane %v267_v54, 1  ;;  %v335_v61 = vrot.slane %v268_v55, 1  ;;  %v363_v3 = vsel %vm361_vm9, %v359_v49, %v312_v33  ;;  %v375_v4 = vsel %vm373_vm11, %v371_v62, %v334_v57 }
  0x97   : > { %v276_v0 = vsel %vm275_vm8, %v692_v53, %v693_v52  ;;  %v370_v6 = vsel %vm369_vm10, %v366_v51, %v326_v23  ;;  %v372_v1 = vsel %vm369_vm10, %v368_v58, %v327_v24  ;;  %v386_v16 = vpack.c.bf16 %v375_v4, %v363_v3 }
  0x98   : > { %v270_v63 = vpop.permute.xlu1 %269  ;;  %v222_v2 = vpop.permute.xlu0 %221  ;;  %v374_v11 = vsel %vm373_vm11, %v370_v6, %v333_v56  ;;  %v376_v19 = vsel %vm373_vm11, %v372_v1, %v335_v61  ;;  %v343_v20 = vrot.slane %v276_v0, 6  ;;  %v726_v32 = vmov 65535  }
  0x99   : > { %v226_v8 = vsel %vm225_vm6, %v688_v36, %v222_v2  ;;  %v228_v9 = vsel %vm225_vm6, %v222_v2, %v687_v37  ;;  %v277_v12 = vsel %vm275_vm8, %v270_v63, %v692_v53  ;;  %v278_v13 = vsel %vm275_vm8, %v693_v52, %v270_v63  ;;  %407 = vmatprep.subr.bf16.mxu0 %v386_v16 }
  0x9a   : > { %v358_v14 = vsel %vm357_vm7, %v228_v9, %v302_v60  ;;  %v360_v15 = vsel %vm357_vm7, %v226_v8, %v304_v59  ;;  %v342_v25 = vrot.slane %v277_v12, 6  ;;  %v344_v26 = vrot.slane %v278_v13, 6  ;;  %v210_v59 = vld [vmem:[%s902_s0] sm:$0x7] }
  0x9b   : > { %v362_v17 = vsel %vm361_vm9, %v358_v14, %v311_v28  ;;  %v364_v18 = vsel %vm361_vm9, %v360_v15, %v313_v42  ;;  %v396_v33 = vsel %vm381_vm15, 4294967295, %v726_v32  ;;  %v379_v39 = vsel %vm377_vm13, %v334_v57, %v343_v20 }
  0x9c   : > { %v696_v21 = vpop.permute.xlu0 %695  ;;  %v280_v22 = vpop.permute.xlu1 %279  ;;  %v385_v23 = vpack.c.bf16 %v374_v11, %v362_v17  ;;  %v387_v24 = vpack.c.bf16 %v376_v19, %v364_v18  ;;  %v378_v42 = vsel %vm377_vm13, %v333_v56, %v342_v25  ;;  %v380_v43 = vsel %vm377_vm13, %v335_v61, %v344_v26  ;;  %v391_v56 = vld [vmem:[%s904_s2] sm:$0x3] }
  0x9d   : > { %v698_v27 = vunpack.i.h.bf16 %v696_v21  ;;  %v697_v29 = vunpack.i.l.bf16 %v696_v21  ;;  %v397_v49 = vsel %vm361_vm9, %v396_v33, 0  ;;  %v505_v57 = vsub.s32 2, %v496_v10 }
  0x9e   : > { %408 = vmatpush1.bf16.msra.mxu0 %v385_v23  ;;  %636 = vmatpush3.bf16.msra.mxu1 %v387_v24  ;;  %v497_v58 = vsub.s32 0, %v496_v10  ;;  %v501_v60 = vsub.s32 1, %v496_v10  ;;  %vm532_vm2 = vcmask 11264  }
  0x9f   : > { %v286_v28 = vsel %vm285_vm12, %v697_v29, %v698_v27  ;;  %v287_v30 = vsel %vm285_vm12, %v280_v22, %v697_v29  ;;  %v288_v31 = vsel %vm285_vm12, %v698_v27, %v280_v22  ;;  %637 = vmatprep.subr.bf16.mxu1 %v720_v5  ;;  %v506_v61 = vrot.slane %v210_v59, %v505_v57 }
  0xa0   : > { %v351_v34 = vrot.slane %v287_v30, 3  ;;  %v352_v35 = vrot.slane %v286_v28, 3  ;;  %v353_v36 = vrot.slane %v288_v31, 3  ;;  %v701_v37 = vpop.permute.xlu0 %700  ;;  %v290_v38 = vpop.permute.xlu1 %289  ;;  %v498_v62 = vrot.slane %v210_v59, %v497_v58 }
  0xa1   : > { %v703_v40 = vunpack.i.h.bf16 %v701_v37  ;;  %v702_v41 = vunpack.i.l.bf16 %v701_v37  ;;  %v502_v63 = vrot.slane %v210_v59, %v501_v60 }
  0xa2   : > { %v382_v44 = vsel %vm381_vm15, %v378_v42, %v351_v34  ;;  %v384_v5 = vsel %vm381_vm15, %v380_v43, %v353_v36  ;;  %v383_v45 = vsel %vm381_vm15, %v379_v39, %v352_v35 }
  0xa3   : > { %v296_v46 = vsel %vm295_vm14, %v702_v41, %v703_v40  ;;  %v297_v47 = vsel %vm295_vm14, %v290_v38, %v702_v41  ;;  %v298_v48 = vsel %vm295_vm14, %v703_v40, %v290_v38 }
  0xa4   : > { %v388_v50 = vpack.c.bf16 %v297_v47, %v382_v44  ;;  %v390_v51 = vpack.c.bf16 %v298_v48, %v384_v5  ;;  %v389_v52 = vpack.c.bf16 %v296_v46, %v383_v45 }
  0xa6   : > { %v402_v53 = vand.u32 %v397_v49, %v389_v52  ;;  %v405_v54 = vand.u32 %v397_v49, %v390_v51  ;;  %v399_v55 = vand.u32 %v397_v49, %v388_v50 }
  0xa8   : > { %409 = vmatprep.subr.bf16.mxu0 %v402_v53  ;;  %638 = vmatpush3.bf16.msra.mxu1 %v405_v54 }
  0xa9   : > { %410 = vmatpush1.bf16.msra.mxu0 %v399_v55 }
  0xab   : > { %640 = vmatmul.mubr.msk.bf16.vlgmr.msra.gmra.mrb[0].mxu1 %vm392_vm0, %v391_v56 }
  0xac   : > { %628 = vmatmul.mubr.msk.bf16.vlgmr.msra.gmra.mrb[0].mxu0 %vm392_vm0, %v391_v56 }
 0x17e   : > { %v482_v0 = vpop.f32.mrb[0].mxu1 }
 0x17f   : > { %v441_v2 = vpop.f32.mrb[0].mxu0  ;;  %493 = vst [vmem:[%s204_s9 + $0x8] sm:$0xf] %v482_v0  ;;  %v512_v3 = vmul.f32 %v506_v61, %v482_v0  ;;  %v641_v7 = vpop.f32.mrb[1].mxu1 }
 0x180   : > { %v510_v4 = vmul.f32 %v498_v62, %v441_v2  ;;  %v443_v6 = vpop.f32.mrb[1].mxu0  ;;  %v485_v8 = vpop.f32.mrb[2].mxu1 }
 0x181   : > { %v522_v9 = vmul.f32 %v512_v3, %v512_v3  ;;  %v490_v11 = vcombine.low %v441_v2, %v443_v6  ;;  %v511_v1 = vmul.f32 %v502_v63, %v443_v6  ;;  %v445_v12 = vpop.f32.mrb[2].mxu0  ;;  %v642_v13 = vpop.f32.mrb[3].mxu1  ;;  %v516_v19 = vsel %vm369_vm10, %v512_v3, 0.0 }
 0x182   : > { %v513_v14 = vsel %vm369_vm10, %v510_v4, 0.0  ;;  %v520_v15 = vmul.f32 %v510_v4, %v510_v4  ;;  %v446_v16 = vpop.f32.mrb[3].mxu0 }
 0x183   : > { %492 = vst [vmem:[%s204_s9] sm:$0xff] %v490_v11  ;;  %v514_v17 = vsel %vm369_vm10, %v511_v1, 0.0  ;;  %v521_v18 = vmul.f32 %v511_v1, %v511_v1  ;;  %v526_v23 = vsel %vm369_vm10, %v522_v9, 0.0 }
 0x184   : > { %v515_v20 = vadd.f32 %v514_v17, %v513_v14  ;;  %v523_v21 = vsel %vm369_vm10, %v520_v15, 0.0 }
 0x185   : > { %v524_v22 = vsel %vm369_vm10, %v521_v18, 0.0 }
 0x186   : > { %v517_v24 = vadd.f32 %v516_v19, %v515_v20  ;;  %v525_v25 = vadd.f32 %v524_v22, %v523_v21 }
 0x188   : > { %518 = vadd.xlane.f32.xlu0 %v517_v24  ;;  %v527_v26 = vadd.f32 %v526_v23, %v525_v25 }
 0x18a   : > { %528 = vadd.xlane.f32.xlu1 %v527_v26 }
 0x215   : > { %v519_v27 = vpop.xlane.xlu0 %518 }
 0x217   : > { %v529_v29 = vpop.xlane.xlu1 %528 }
 0x218   : > { %v531_v28 = vsel %vm530_vm1, %v519_v27, %v529_v29 }
 0x219   : > { %533 = vst.msk [vmem:[%s208_s13] sm:$0xf] %vm532_vm2, %v531_v28 }
 0x21a PF: > { %s15_s15 = sadd.s32 1, %s713_s15  }
 0x21b   : > { %p12_p4 = scmp.ge.s32.totalorder %s15_s15, 4  }
 0x21d   :  { %14 = sbr.rel (!%p12_p4) target bundleno = 1 (0x1), region = 74 }

// kernel: encoder_sh_forward.7
= control target key start
LH: loop header
LB: loop body
LE: loop exit
PB: predicated region body
PF: predicated region fallthrough
CT: control target
= control target key end

     0   :  { %s898_s24 = smov 0   ;;  %s1063_s0 = inlined_call_operand.vmem [shape: f32[1,384], index: 0, kind: input, shape index: {}]   ;;  %s1064_s1 = inlined_call_operand.vmem [shape: f32[2,4,384], index: 1, kind: input, shape index: {}]   ;;  %s1065_s2 = inlined_call_operand.vmem [shape: bf16[4,36], index: 2, kind: input, shape index: {}]   ;;  %s1066_s3 = inlined_call_operand.vmem [shape: f32[4,1], index: 3, kind: input, shape index: {}]   ;;  %s1067_s4 = inlined_call_operand.vmem [shape: f32[4,1], index: 4, kind: input, shape index: {}]   ;;  %s1068_s5 = inlined_call_operand.vmem [shape: f32[2,4,384], index: 5, kind: output, shape index: {0}]   ;;  %s1069_s6 = inlined_call_operand.vmem [shape: f32[2,4,2], index: 6, kind: output, shape index: {1}]   ;;  %s1070_s7 = inlined_call_operand.vmem [shape: f32[2,4,384], index: 7, kind: output, shape index: {2}]  }
   0x1 LB: > { %s748_s25 = sadd.s32 4294967295, %s844_s24   ;;  %p752_p0 = scmp.ge.s32.totalorder %s844_s24, 1  ;;  %s844_s24 = sphi %s898_s24, %s18_s24  }
   0x2   : > { %p242_p1 = scmp.lt.s32.totalorder %s844_s24, 3 }
   0x4   : > { %p243_p2 = pnand %p752_p0, %p242_p1 }
   0x5   : > { %v306_v0 = vld [vmem:[%s1066_s3] sm:$0xf] (!%p243_p2)  ;;  %v846_v1 = vmov (!%p243_p2), 0   ;;  %p283_p3 = scmp.lt.s32.totalorder (!%p243_p2), %s748_s25, 1  ;;  %v847_v3 = vmov (!%p243_p2), 839922192   ;;  %v314_v5 = vlaneseq (!%p243_p2) }
   0x6   : > { %246 = sbr.rel (%p243_p2) target bundleno = 668 (0x29c), region = 40  ;;  %797 = vset.pattern.permute.xlu0 (!%p243_p2), %v846_v1  ;;  %550 = vmatprep.mubr.bf16.mxu0 (!%p243_p2), %v846_v1  ;;  %v321_v2 = vld [vmem:[%s1067_s4] sm:$0xf] (!%p243_p2)  ;;  %v312_v4 = vunpack.c.l.s4 (!%p243_p2), %v847_v3  ;;  %s848_s16 = smov (!%p243_p2), 1   ;;  %v854_v34 = vmov (!%p243_p2), 0.0   ;;  %vm857_vm0 = vmmov (!%p243_p2), 0  }
   0x7   : > { %309 = vperm.xlu0 (!%p243_p2), %797, %v306_v0   ;;  %v315_v7 = vshrl.u32 (!%p243_p2), %v314_v5, 7  ;;  %v303_v12 = vld [vmem:[%s1063_s0] sm:$0x7] (!%p243_p2)  ;;  %s849_s17 = smov (!%p243_p2), 18   ;;  %s850_s18 = smov (!%p243_p2), 17   ;;  %766 = vmatprep.subr.bf16.mxu1 (!%p243_p2), %v854_v34  ;;  %v965_v39 = vand.u32 (!%p243_p2), 127, %v314_v5 }
   0x8   : > { %v313_v6 = vunpack.c.0.s8 (!%p243_p2), %v312_v4  ;;  %s851_s19 = smov (!%p243_p2), 19   ;;  %s852_s20 = smov (!%p243_p2), 110   ;;  %772 = vmatprep.mubr.msk.bf16.mxu1 (!%p243_p2), %vm857_vm0, %v854_v34  ;;  %vm481_vm5 = vcmask (!%p243_p2), 1043456   ;;  %vm508_vm10 = vcmask (!%p243_p2), 1041408   ;;  %vm504_vm11 = vcmask (!%p243_p2), 293888  }
   0x9   : > { %v341_v9 = vsub.s32 (!%p243_p2), 0, %v315_v7  ;;  %v345_v10 = vsub.s32 (!%p243_p2), 1, %v315_v7  ;;  %v349_v16 = vsub.s32 (!%p243_p2), 2, %v315_v7  ;;  %s853_s21 = smov (!%p243_p2), 127   ;;  %s855_s22 = smov (!%p243_p2), 111   ;;  %vm381_vm1 = vcmp.lt.s32.totalorder (!%p243_p2), %v965_v39, 18 }
   0xa   : > { %v316_v8 = vsub.s32 (!%p243_p2), %v313_v6, %v315_v7  ;;  %s856_s23 = smov (!%p243_p2), 109   ;;  %vm371_vm2 = vcmp.lt.s32.totalorder (!%p243_p2), %v965_v39, 19  ;;  %vm411_vm3 = vcmp.lt.s32.totalorder (!%p243_p2), %v965_v39, 127  ;;  %vm401_vm4 = vcmp.lt.s32.totalorder (!%p243_p2), %v965_v39, 1 }
   0xb   : > { %324 = vperm.xlu0 (!%p243_p2), %797, %v321_v2   ;;  %v925_v17 = vrot.slane (!%p243_p2), %v303_v12, %v341_v9  ;;  %v927_v18 = vrot.slane (!%p243_p2), %v303_v12, %v345_v10  ;;  %v929_v25 = vrot.slane (!%p243_p2), %v303_v12, %v349_v16  ;;  %vm391_vm6 = vcmp.lt.s32.totalorder (!%p243_p2), %v965_v39, 17 }
   0xc   : > { %vm431_vm7 = vcmp.lt.s32.totalorder (!%p243_p2), %v965_v39, 110  ;;  %vm421_vm8 = vcmp.lt.s32.totalorder (!%p243_p2), %v965_v39, 111  ;;  %vm441_vm9 = vcmp.lt.s32.totalorder (!%p243_p2), %v965_v39, 109  ;;  %vm625_vm12 = vcmask (!%p243_p2), 7168  }
   0xd   : > { %s1072_s25 = smov (!%p283_p3, %s748_s25), 1  ;;  %v354_v26 = vcombine.low %v925_v17, %v927_v18  ;;  %vm627_vm13 = vcmask 11264  }
   0xe   : > { %s916_s30 = smul.u32 12, %s1072_s25 }
  0x10   : > { %s287_s10 = scalar_lea.vmem %s1064_s1, %s916_s30  ;;  %s301_s15 = scalar_lea.vmem %s1070_s7, %s916_s30 }
  0x11   : > { %v304_v14 = vld [vmem:[%s287_s10] sm:$0xff]  ;;  %v305_v15 = vld [vmem:[%s287_s10 + $0x8] sm:$0xf]  ;;  %s292_s8 = scalar_lea.vmem %s1068_s5, %s916_s30  ;;  %s755_s30 = sshll.u32 %s1072_s25, 2 }
  0x12   : > { %s296_s11 = scalar_lea.vmem %s1069_s6, %s755_s30 }
  0x86   : > { %v310_v11 = vpop.permute.xlu0 %309 }
  0x87   : > { %v317_v13 = vrot.slane %v310_v11, %v316_v8 }
  0x89   : > { %v319_v20 = vmul.f32 %v317_v13, %v304_v14  ;;  %v320_v21 = vmul.f32 %v317_v13, %v305_v15 }
  0x8a   : > { %v325_v19 = vpop.permute.xlu0 %324 }
  0x8b   : > { %v332_v22 = vrot.slane %v325_v19, %v316_v8 }
  0x8d   : > { %v334_v23 = vadd.f32 %v332_v22, %v319_v20  ;;  %v335_v24 = vadd.f32 %v332_v22, %v320_v21 }
  0x8f   : > { %v336_v27 = vmax.f32 %v334_v23, 0.0  ;;  %v337_v28 = vmax.f32 %v335_v24, 0.0 }
  0x91   : > { %v937_v29 = vmul.f32 %v354_v26, %v336_v27  ;;  %v940_v30 = vmul.f32 %v929_v25, %v337_v28 }
  0x93   : > { %358 = vst [vmem:[%s301_s15] sm:$0xff] %v937_v29  ;;  %359 = vst [vmem:[%s301_s15 + $0x8] sm:$0xf] %v940_v30  ;;  %399 = vrot.lane.b32.xlu1 %v940_v30, %s848_s16  ;;  %379 = vrot.lane.b32.xlu0 %v940_v30, %s849_s17  ;;  %v950_v31 = vcombine.high %v937_v29, %v937_v29 }
  0x95   : > { %v808_v32 = vpack.i.bf16 %v950_v31, %v937_v29  ;;  %v818_v33 = vpack.i.bf16 %v940_v30, %v950_v31 }
  0x97   : > { %389 = vrot.lane.b32.xlu1 %v940_v30, %s850_s18  ;;  %367 = vrot.lane.b32.xlu0 %v940_v30, %s851_s19 }
  0x9b   : > { %425 = vrot.lane.b32.xlu1 %v937_v29, %s852_s20  ;;  %405 = vrot.lane.b32.xlu0 %v937_v29, %s853_s21 }
  0x9f   : > { %809 = vrot.lane.b32.xlu0 %v808_v32, %s851_s19  ;;  %799 = vrot.lane.b32.xlu1 %v808_v32, %s849_s17 }
  0xa3   : > { %819 = vrot.lane.b32.xlu0 %v818_v33, %s853_s21  ;;  %804 = vrot.lane.b32.xlu1 %v808_v32, %s848_s16 }
  0xa7   : > { %829 = vrot.lane.b32.xlu0 %v818_v33, %s855_s22  ;;  %814 = vrot.lane.b32.xlu1 %v808_v32, %s850_s18 }
  0xab   : > { %834 = vrot.lane.b32.xlu0 %v808_v32, %s856_s23  ;;  %824 = vrot.lane.b32.xlu1 %v818_v33, %s852_s20 }
  0xaf   : > { %415 = vrot.lane.b32.xlu1 %v937_v29, %s855_s22 }
  0xb3   : > { %439 = vrot.lane.b32.xlu1 %v940_v30, %s856_s23 }
 0x105   : > { %v400_v35 = vpop.permute.xlu1 %399  ;;  %v380_v36 = vpop.permute.xlu0 %379 }
 0x109   : > { %v962_v37 = vpop.permute.xlu1 %389  ;;  %v368_v38 = vpop.permute.xlu0 %367 }
 0x10d   : > { %v967_v40 = vpop.permute.xlu1 %425  ;;  %v406_v41 = vpop.permute.xlu0 %405 }
 0x111   : > { %v810_v42 = vpop.permute.xlu0 %809  ;;  %v800_v43 = vpop.permute.xlu1 %799 }
 0x112   : > { %v812_v44 = vunpack.i.h.bf16 %v810_v42  ;;  %v811_v45 = vunpack.i.l.bf16 %v810_v42  ;;  %v802_v46 = vunpack.i.h.bf16 %v800_v43  ;;  %v801_v47 = vunpack.i.l.bf16 %v800_v43 }
 0x114   : > { %v382_v48 = vsel %vm381_vm1, %v802_v46, %v380_v36  ;;  %v384_v49 = vsel %vm381_vm1, %v380_v36, %v801_v47  ;;  %v383_v50 = vsel %vm381_vm1, %v801_v47, %v802_v46  ;;  %v373_v54 = vsel %vm371_vm2, %v811_v45, %v812_v44 }
 0x115   : > { %v450_v51 = vrot.slane %v382_v48, 4  ;;  %v820_v52 = vpop.permute.xlu0 %819  ;;  %v805_v53 = vpop.permute.xlu1 %804  ;;  %v449_v55 = vrot.slane %v383_v50, 4  ;;  %v372_v56 = vsel %vm371_vm2, %v812_v44, %v368_v38  ;;  %v448_v61 = vrot.slane %v384_v49, 4 }
 0x116   : > { %v822_v57 = vunpack.i.h.bf16 %v820_v52  ;;  %v821_v58 = vunpack.i.l.bf16 %v820_v52  ;;  %v807_v59 = vunpack.i.h.bf16 %v805_v53  ;;  %v806_v60 = vunpack.i.l.bf16 %v805_v53 }
 0x117   : > { %v483_v62 = vsel %vm481_vm5, %v373_v54, %v449_v55  ;;  %v484_v63 = vsel %vm481_vm5, %v372_v56, %v450_v51  ;;  %v374_v9 = vsel %vm371_vm2, %v368_v38, %v811_v45 }
 0x118   : > { %v414_v0 = vsel %vm411_vm3, %v822_v57, %v406_v41  ;;  %v412_v1 = vsel %vm411_vm3, %v821_v58, %v822_v57  ;;  %v413_v2 = vsel %vm411_vm3, %v406_v41, %v821_v58  ;;  %v402_v3 = vsel %vm401_vm4, %v807_v59, %v400_v35 }
 0x119   : > { %v468_v4 = vrot.slane %v414_v0, 4  ;;  %v466_v5 = vrot.slane %v413_v2, 4  ;;  %v467_v6 = vrot.slane %v412_v1, 4  ;;  %v830_v7 = vpop.permute.xlu0 %829  ;;  %v815_v8 = vpop.permute.xlu1 %814  ;;  %v404_v10 = vsel %vm401_vm4, %v400_v35, %v806_v60 }
 0x11a   : > { %v832_v11 = vunpack.i.h.bf16 %v830_v7  ;;  %v831_v12 = vunpack.i.l.bf16 %v830_v7  ;;  %v817_v13 = vunpack.i.h.bf16 %v815_v8  ;;  %v459_v14 = vrot.slane %v402_v3, 4 }
 0x11b   : > { %v457_v15 = vrot.slane %v404_v10, 4  ;;  %v816_v16 = vunpack.i.l.bf16 %v815_v8  ;;  %v403_v19 = vsel %vm401_vm4, %v806_v60, %v807_v59  ;;  %v482_v23 = vsel %vm481_vm5, %v374_v9, %v448_v61 }
 0x11c   : > { %v458_v20 = vrot.slane %v403_v19, 4  ;;  %v392_v21 = vsel %vm391_vm6, %v817_v13, %v962_v37  ;;  %v422_v22 = vsel %vm421_vm8, %v831_v12, %v832_v11  ;;  %v489_v33 = vsel %vm481_vm5, %v950_v31, %v467_v6 }
 0x11d   : > { %v835_v24 = vpop.permute.xlu0 %834  ;;  %v825_v26 = vpop.permute.xlu1 %824  ;;  %v393_v27 = vsel %vm391_vm6, %v816_v16, %v817_v13  ;;  %v487_v28 = vsel %vm481_vm5, %v392_v21, %v459_v14  ;;  %v394_v32 = vsel %vm391_vm6, %v962_v37, %v816_v16  ;;  %v490_v41 = vsel %vm481_vm5, %v940_v30, %v468_v4  ;;  %v503_v4 = vld [vmem:[%s1065_s2] sm:$0x3] }
 0x11e   : > { %v837_v35 = vunpack.i.h.bf16 %v835_v24  ;;  %v827_v36 = vunpack.i.h.bf16 %v825_v26  ;;  %v826_v38 = vunpack.i.l.bf16 %v825_v26  ;;  %v836_v42 = vunpack.i.l.bf16 %v835_v24 }
 0x11f   : > { %v486_v43 = vsel %vm481_vm5, %v393_v27, %v458_v20  ;;  %v496_v44 = vpack.c.bf16 %v487_v28, %v484_v63  ;;  %v485_v45 = vsel %vm481_vm5, %v394_v32, %v457_v15  ;;  %v488_v54 = vsel %vm481_vm5, %v937_v29, %v466_v5 }
 0x120   : > { %v434_v46 = vsel %vm431_vm7, %v827_v36, %v967_v40  ;;  %v432_v37 = vsel %vm431_vm7, %v826_v38, %v827_v36  ;;  %v433_v31 = vsel %vm431_vm7, %v967_v40, %v826_v38  ;;  %v495_v47 = vpack.c.bf16 %v486_v43, %v483_v62 }
 0x121   : > { %v477_v48 = vrot.slane %v434_v46, 4  ;;  %v475_v30 = vrot.slane %v433_v31, 4  ;;  %v476_v49 = vrot.slane %v432_v37, 4  ;;  %767 = vmatpush3.bf16.msra.mxu1 %v496_v44  ;;  %v416_v50 = vpop.permute.xlu1 %415  ;;  %v494_v51 = vpack.c.bf16 %v485_v45, %v482_v23 }
 0x122   : > { %518 = vmatprep.subr.bf16.mxu0 %v495_v47  ;;  %v423_v52 = vsel %vm421_vm8, %v416_v50, %v831_v12  ;;  %v424_v53 = vsel %vm421_vm8, %v832_v11, %v416_v50  ;;  %768 = vmatprep.subr.bf16.mxu1 %v854_v34  ;;  %v443_v57 = vsel %vm441_vm9, %v836_v42, %v837_v35 }
 0x123   : > { %v491_v40 = vsel %vm481_vm5, %v423_v52, %v475_v30  ;;  %v493_v55 = vsel %vm481_vm5, %v424_v53, %v477_v48  ;;  %519 = vmatpush1.bf16.msra.mxu0 %v494_v51  ;;  %v492_v56 = vsel %vm481_vm5, %v422_v22, %v476_v49  ;;  %v500_v63 = vpack.c.bf16 %v443_v57, %v443_v57 }
 0x124   : > { %v498_v58 = vpack.c.bf16 %v492_v56, %v489_v33  ;;  %v499_v59 = vpack.c.bf16 %v493_v55, %v490_v41  ;;  %v497_v60 = vpack.c.bf16 %v491_v40, %v488_v54 }
 0x125   : > { %v440_v61 = vpop.permute.xlu1 %439  ;;  %v510_v3 = vsel %vm508_vm10, %v500_v63, 0 }
 0x126   : > { %v442_v62 = vsel %vm441_vm9, %v837_v35, %v440_v61  ;;  %v444_v29 = vsel %vm441_vm9, %v440_v61, %v836_v42  ;;  %520 = vmatprep.subr.bf16.mxu0 %v498_v58  ;;  %769 = vmatpush3.bf16.msra.mxu1 %v499_v59 }
 0x127   : > { %v501_v0 = vpack.c.bf16 %v442_v62, %v442_v62  ;;  %v502_v1 = vpack.c.bf16 %v444_v29, %v444_v29  ;;  %521 = vmatpush1.bf16.msra.mxu0 %v497_v60  ;;  %770 = vmatprep.subr.bf16.mxu1 %v854_v34 }
 0x129   : > { %757 = vmatprep.subr.msk.bf16.mxu0 %vm508_vm10, %v501_v0  ;;  %v516_v2 = vsel %vm508_vm10, %v502_v1, 0 }
 0x12a   : > { %771 = vmatpush3.bf16.msra.mxu1 %v516_v2 }
 0x12b   : > { %523 = vmatpush1.bf16.msra.mxu0 %v510_v3 }
 0x12d   : > { %773 = vmatmul.mubr.msk.bf16.vlgmr.msra.gmra.mrb[0].mxu1 %vm504_vm11, %v503_v4 }
 0x12e   : > { %758 = vmatmul.mubr.msk.bf16.vlgmr.msra.gmra.mrb[0].mxu0 %vm504_vm11, %v503_v4 }
 0x200   : > { %v593_v39 = vpop.f32.mrb[0].mxu1 }
 0x201   : > { %v552_v5 = vpop.f32.mrb[0].mxu0  ;;  %604 = vst [vmem:[%s292_s8 + $0x8] sm:$0xf] %v593_v39  ;;  %v607_v34 = vmul.f32 %v593_v39, %v929_v25  ;;  %v774_v6 = vpop.f32.mrb[1].mxu1 }
 0x202   : > { %v605_v7 = vmul.f32 %v552_v5, %v925_v17  ;;  %v554_v8 = vpop.f32.mrb[1].mxu0  ;;  %v596_v9 = vpop.f32.mrb[2].mxu1 }
 0x203   : > { %v617_v10 = vmul.f32 %v607_v34, %v607_v34  ;;  %v601_v11 = vcombine.low %v552_v5, %v554_v8  ;;  %v606_v12 = vmul.f32 %v554_v8, %v927_v18  ;;  %v556_v13 = vpop.f32.mrb[2].mxu0  ;;  %v775_v14 = vpop.f32.mrb[3].mxu1  ;;  %v611_v21 = vsel %vm481_vm5, %v607_v34, 0.0 }
 0x204   : > { %v608_v15 = vsel %vm481_vm5, %v605_v7, 0.0  ;;  %v615_v16 = vmul.f32 %v605_v7, %v605_v7  ;;  %v557_v19 = vpop.f32.mrb[3].mxu0 }
 0x205   : > { %603 = vst [vmem:[%s292_s8] sm:$0xff] %v601_v11  ;;  %v609_v20 = vsel %vm481_vm5, %v606_v12, 0.0  ;;  %v616_v25 = vmul.f32 %v606_v12, %v606_v12  ;;  %v621_v18 = vsel %vm481_vm5, %v617_v10, 0.0 }
 0x206   : > { %v610_v17 = vadd.f32 %v609_v20, %v608_v15  ;;  %v618_v22 = vsel %vm481_vm5, %v615_v16, 0.0 }
 0x207   : > { %v619_v23 = vsel %vm481_vm5, %v616_v25, 0.0 }
 0x208   : > { %v612_v24 = vadd.f32 %v611_v21, %v610_v17  ;;  %v620_v26 = vadd.f32 %v619_v23, %v618_v22 }
 0x20a   : > { %613 = vadd.xlane.f32.xlu0 %v612_v24  ;;  %v622_v27 = vadd.f32 %v621_v18, %v620_v26 }
 0x20c   : > { %623 = vadd.xlane.f32.xlu1 %v622_v27 }
 0x297   : > { %v614_v28 = vpop.xlane.xlu0 %613 }
 0x299   : > { %v624_v32 = vpop.xlane.xlu1 %623 }
 0x29a   : > { %v626_v33 = vsel %vm625_vm12, %v614_v28, %v624_v32 }
 0x29b   : > { %628 = vst.msk [vmem:[%s296_s11] sm:$0xf] %vm627_vm13, %v626_v33 }
 0x29c PF: > { %s18_s24 = sadd.s32 1, %s844_s24  }
 0x29d   : > { %p15_p4 = scmp.ge.s32.totalorder %s18_s24, 4  }
 0x29f   :  { %17 = sbr.rel (!%p15_p4) target bundleno = 1 (0x1), region = 94 }

// kernel: encoder_sh_forward.8
= control target key start
LH: loop header
LB: loop body
LE: loop exit
PB: predicated region body
PF: predicated region fallthrough
CT: control target
= control target key end

     0   :  { %s920_s21 = smov 0   ;;  %s988_s0 = inlined_call_operand.vmem [shape: s32[1,64], index: 0, kind: input, shape index: {}]   ;;  %s989_s1 = inlined_call_operand.vmem [shape: f32[2,4,64], index: 1, kind: input, shape index: {}]   ;;  %s990_s2 = inlined_call_operand.vmem [shape: f32[2,4,64], index: 2, kind: input, shape index: {}]   ;;  %s991_s3 = inlined_call_operand.vmem [shape: f32[2,4,64], index: 3, kind: input, shape index: {}]   ;;  %s992_s4 = inlined_call_operand.vmem [shape: f32[2,4,64], index: 4, kind: input, shape index: {}]   ;;  %s993_s5 = inlined_call_operand.vmem [shape: f32[4,1], index: 5, kind: input, shape index: {}]   ;;  %s994_s6 = inlined_call_operand.vmem [shape: f32[4,1], index: 6, kind: input, shape index: {}]   ;;  %s995_s7 = inlined_call_operand.vmem [shape: f32[2,4,64], index: 7, kind: output, shape index: {0}]   ;;  %s996_s8 = inlined_call_operand.vmem [shape: f32[2,4,64], index: 8, kind: output, shape index: {1}]   ;;  %s997_s9 = inlined_call_operand.vmem [shape: f32[2,4,64], index: 9, kind: output, shape index: {2}]   ;;  %s998_s10 = inlined_call_operand.vmem [shape: f32[2,4,64], index: 10, kind: output, shape index: {3}]   ;;  %s999_s11 = inlined_call_operand.vmem [shape: f32[2,4,64], index: 11, kind: output, shape index: {4}]   ;;  %s1000_s12 = inlined_call_operand.vmem [shape: s32[2,4,64], index: 12, kind: output, shape index: {5}]  }
   0x1 LB: > { %s819_s22 = sadd.s32 4294967295, %s852_s21   ;;  %p823_p0 = scmp.ge.s32.totalorder %s852_s21, 1  ;;  %s852_s21 = sphi %s920_s21, %s23_s21  }
   0x2   : > { %p399_p1 = scmp.lt.s32.totalorder %s852_s21, 3 }
   0x4   : > { %p400_p2 = pnand %p823_p0, %p399_p1 }
   0x5   : > { %v511_v0 = vld [vmem:[%s993_s5] sm:$0xf] (!%p400_p2)  ;;  %v854_v1 = vmov (!%p400_p2), 0   ;;  %p471_p3 = scmp.lt.s32.totalorder (!%p400_p2), %s819_s22, 1  ;;  %v545_v3 = vlaneseq (!%p400_p2)  ;;  %vm528_vm0 = vcmask (!%p400_p2), 519168  }
   0x6   : > { %403 = sbr.rel (%p400_p2) target bundleno = 150 (0x96), region = 48  ;;  %845 = vset.pattern.permute.xlu0 (!%p400_p2), %v854_v1  ;;  %v512_v2 = vld [vmem:[%s994_s6] sm:$0xf] (!%p400_p2) }
   0x7   : > { %517 = vperm.xlu0 (!%p400_p2), %845, %v511_v0   ;;  %v546_v4 = vshrl.u32 (!%p400_p2), %v545_v3, 7  ;;  %v513_v5 = vld [vmem:[%s988_s0] sm:$0x1] (!%p400_p2) }
   0x8   : > { %v550_v12 = vadd.s32 (!%p400_p2), 1, %v513_v5  ;;  %v558_v17 = vadd.s32 (!%p400_p2), 16, %v513_v5  ;;  %v566_v25 = vadd.s32 (!%p400_p2), 17, %v513_v5 }
   0x9   : > { %v547_v11 = vsub.s32 (!%p400_p2), 0, %v546_v4 }
   0xb   : > { %523 = vperm.xlu0 (!%p400_p2), %845, %v512_v2   ;;  %v548_v23 = vrot.slane (!%p400_p2), %v513_v5, %v547_v11  ;;  %v554_v24 = vrot.slane (!%p400_p2), %v550_v12, %v547_v11  ;;  %v562_v30 = vrot.slane (!%p400_p2), %v558_v17, %v547_v11  ;;  %v570_v31 = vrot.slane (!%p400_p2), %v566_v25, %v547_v11 }
   0xd   : > { %s1002_s22 = smov (!%p471_p3, %s819_s22), 1 }
   0xe   : > { %s934_s27 = sshll.u32 %s1002_s22, 2 }
   0xf   : > { %s474_s30 = scalar_lea.vmem %s989_s1, %s934_s27  ;;  %s478_s15 = scalar_lea.vmem %s990_s2, %s934_s27 }
  0x10   : > { %s482_s18 = scalar_lea.vmem %s991_s3, %s934_s27  ;;  %s486_s22 = scalar_lea.vmem %s992_s4, %s934_s27  ;;  %v514_v6 = vld [vmem:[%s474_s30] sm:$0xf] }
  0x11   : > { %v530_v8 = vld [vmem:[%s478_s15] sm:$0xf]  ;;  %s490_s28 = scalar_lea.vmem %s995_s7, %s934_s27  ;;  %s494_s13 = scalar_lea.vmem %s996_s8, %s934_s27 }
  0x12   : > { %v535_v9 = vld [vmem:[%s482_s18] sm:$0xf]  ;;  %s498_s16 = scalar_lea.vmem %s997_s9, %s934_s27  ;;  %s502_s19 = scalar_lea.vmem %s998_s10, %s934_s27 }
  0x13   : > { %v540_v10 = vld [vmem:[%s486_s22] sm:$0xf]  ;;  %s506_s23 = scalar_lea.vmem %s999_s11, %s934_s27  ;;  %s510_s26 = scalar_lea.vmem %s1000_s12, %s934_s27 }
  0x86   : > { %v518_v7 = vpop.permute.xlu0 %517 }
  0x87   : > { %v520_v13 = vmul.f32 %v518_v7, %v514_v6  ;;  %v531_v14 = vmul.f32 %v530_v8, %v518_v7  ;;  %v536_v15 = vmul.f32 %v535_v9, %v518_v7  ;;  %v541_v16 = vmul.f32 %v540_v10, %v518_v7 }
  0x8a   : > { %v524_v18 = vpop.permute.xlu0 %523 }
  0x8b   : > { %v526_v19 = vadd.f32 %v524_v18, %v520_v13  ;;  %v532_v20 = vadd.f32 %v531_v14, %v524_v18  ;;  %v537_v21 = vadd.f32 %v536_v15, %v524_v18  ;;  %v542_v22 = vadd.f32 %v541_v16, %v524_v18 }
  0x8d   : > { %v527_v26 = vmax.f32 %v526_v19, 0.0  ;;  %v533_v27 = vmax.f32 %v532_v20, 0.0  ;;  %v538_v28 = vmax.f32 %v537_v21, 0.0  ;;  %v543_v29 = vmax.f32 %v542_v22, 0.0 }
  0x8f   : > { %529 = vst.msk [vmem:[%s490_s28] sm:$0xf] %vm528_vm0, %v527_v26  ;;  %534 = vst.msk [vmem:[%s494_s13] sm:$0xf] %vm528_vm0, %v533_v27  ;;  %vm549_vm1 = vcmp.gt.f32.partialorder %v533_v27, %v527_v26 }
  0x90   : > { %539 = vst.msk [vmem:[%s498_s16] sm:$0xf] %vm528_vm0, %v538_v28  ;;  %544 = vst.msk [vmem:[%s502_s19] sm:$0xf] %vm528_vm0, %v543_v29  ;;  %v555_v32 = vsel %vm549_vm1, %v554_v24, %v548_v23  ;;  %v556_v33 = vsel %vm549_vm1, %v533_v27, %v527_v26 }
  0x91   : > { %vm557_vm2 = vcmp.gt.f32.partialorder %v538_v28, %v556_v33 }
  0x92   : > { %v563_v34 = vsel %vm557_vm2, %v562_v30, %v555_v32  ;;  %v564_v35 = vsel %vm557_vm2, %v538_v28, %v556_v33 }
  0x93   : > { %vm565_vm3 = vcmp.gt.f32.partialorder %v543_v29, %v564_v35 }
  0x94   : > { %v571_v36 = vsel %vm565_vm3, %v570_v31, %v563_v34  ;;  %v572_v37 = vsel %vm565_vm3, %v543_v29, %v564_v35 }
  0x95   : > { %573 = vst.msk [vmem:[%s506_s23] sm:$0xf] %vm528_vm0, %v572_v37  ;;  %574 = vst.msk [vmem:[%s510_s26] sm:$0xf] %vm528_vm0, %v571_v36 }
  0x96 PF: > { %s23_s21 = sadd.s32 1, %s852_s21  }
  0x97   : > { %p20_p4 = scmp.ge.s32.totalorder %s23_s21, 4  }
  0x99   :  { %22 = sbr.rel (!%p20_p4) target bundleno = 1 (0x1), region = 147 }

// kernel: encoder_sh_forward.10
= control target key start
LH: loop header
LB: loop body
LE: loop exit
PB: predicated region body
PF: predicated region fallthrough
CT: control target
= control target key end

     0   :  { %s629_s24 = smov 0   ;;  %s670_s0 = inlined_call_operand.vmem [shape: f32[1,128], index: 0, kind: input, shape index: {}]   ;;  %s671_s1 = inlined_call_operand.vmem [shape: f32[2,8,128], index: 1, kind: input, shape index: {}]   ;;  %s672_s2 = inlined_call_operand.vmem [shape: bf16[8,72], index: 2, kind: input, shape index: {}]   ;;  %s673_s3 = inlined_call_operand.vmem [shape: f32[8,1], index: 3, kind: input, shape index: {}]   ;;  %s674_s4 = inlined_call_operand.vmem [shape: f32[8,1], index: 4, kind: input, shape index: {}]   ;;  %s675_s5 = inlined_call_operand.vmem [shape: f32[2,8,128], index: 5, kind: output, shape index: {0}]   ;;  %s676_s6 = inlined_call_operand.vmem [shape: f32[2,8,2], index: 6, kind: output, shape index: {1}]   ;;  %s677_s7 = inlined_call_operand.vmem [shape: f32[2,8,128], index: 7, kind: output, shape index: {2}]  }
   0x1 LB: > { %s517_s25 = sadd.s32 4294967295, %s576_s24   ;;  %p521_p0 = scmp.ge.s32.totalorder %s576_s24, 1  ;;  %s576_s24 = sphi %s629_s24, %s18_s24  }
   0x2   : > { %p241_p1 = scmp.lt.s32.totalorder %s576_s24, 3 }
   0x4   : > { %p242_p2 = pnand %p521_p0, %p241_p1 }
   0x5   : > { %v298_v0 = vld [vmem:[%s673_s3] sm:$0xff] (!%p242_p2)  ;;  %v578_v1 = vmov (!%p242_p2), 0   ;;  %p279_p3 = scmp.lt.s32.totalorder (!%p242_p2), %s517_s25, 1  ;;  %v579_v6 = vmov (!%p242_p2), 0.0   ;;  %s580_s16 = smov (!%p242_p2), 9   ;;  %vm586_vm0 = vmmov (!%p242_p2), 0  }
   0x6   : > { %245 = sbr.rel (%p242_p2) target bundleno = 645 (0x285), region = 40  ;;  %569 = vset.pattern.permute.xlu0 (!%p242_p2), %v578_v1  ;;  %v305_v2 = vld [vmem:[%s674_s4] sm:$0xff] (!%p242_p2)  ;;  %536 = vmatprep.subr.bf16.mxu0 (!%p242_p2), %v579_v6  ;;  %s581_s17 = smov (!%p242_p2), 11   ;;  %vm347_vm1 = vcmask (!%p242_p2), 1043456   ;;  %vm343_vm2 = vcmask (!%p242_p2), 588800   ;;  %vm398_vm3 = vcmask (!%p242_p2), 7168  }
   0x7   : > { %301 = vperm.xlu0 (!%p242_p2), %569, %v298_v0   ;;  %v526_v9 = vld [vmem:[%s670_s0] ss:$0 sm:$0xff] (!%p242_p2)  ;;  %s582_s18 = smov (!%p242_p2), 127   ;;  %s583_s19 = smov (!%p242_p2), 10   ;;  %546 = vmatprep.mubr.msk.bf16.mxu0 (!%p242_p2), %vm586_vm0, %v579_v6  ;;  %vm400_vm4 = vcmask (!%p242_p2), 15360  }
   0x8   : > { %s584_s20 = smov (!%p242_p2), 118   ;;  %s585_s21 = smov (!%p242_p2), 1   ;;  %v342_v26 = vld [vmem:[%s672_s2] sm:$0xf] (!%p242_p2) }
   0x9   : > { %s587_s22 = smov (!%p242_p2), 119   ;;  %s588_s23 = smov (!%p242_p2), 117  }
   0xb   : > { %308 = vperm.xlu0 (!%p242_p2), %569, %v305_v2  }
   0xd   : > { %s679_s25 = smov (!%p279_p3, %s517_s25), 1 }
   0xe   : > { %s643_s30 = sshll.u32 %s679_s25, 3 }
   0xf   : > { %s282_s10 = scalar_lea.vmem %s671_s1, %s643_s30  ;;  %s294_s15 = scalar_lea.vmem %s677_s7, %s643_s30 }
  0x10   : > { %v297_v4 = vld [vmem:[%s282_s10] sm:$0xff]  ;;  %s286_s29 = scalar_lea.vmem %s675_s5, %s643_s30  ;;  %s290_s10 = scalar_lea.vmem %s676_s6, %s643_s30 }
  0x86   : > { %v302_v3 = vpop.permute.xlu0 %301 }
  0x87   : > { %v304_v5 = vmul.f32 %v302_v3, %v297_v4 }
  0x8a   : > { %v309_v7 = vpop.permute.xlu0 %308 }
  0x8b   : > { %v311_v8 = vadd.f32 %v309_v7, %v304_v5 }
  0x8d   : > { %v312_v10 = vmax.f32 %v311_v8, 0.0 }
  0x8f   : > { %v319_v11 = vmul.f32 %v526_v9, %v312_v10 }
  0x91   : > { %320 = vst [vmem:[%s294_s15] sm:$0xff] %v319_v11  ;;  %325 = vrot.lane.b32.xlu0 %v319_v11, %s580_s16  ;;  %321 = vrot.lane.b32.xlu1 %v319_v11, %s581_s17 }
  0x95   : > { %329 = vrot.lane.b32.xlu0 %v319_v11, %s582_s18  ;;  %323 = vrot.lane.b32.xlu1 %v319_v11, %s583_s19 }
  0x99   : > { %333 = vrot.lane.b32.xlu0 %v319_v11, %s584_s20  ;;  %327 = vrot.lane.b32.xlu1 %v319_v11, %s585_s21 }
  0x9d   : > { %331 = vrot.lane.b32.xlu1 %v319_v11, %s587_s22 }
  0xa1   : > { %335 = vrot.lane.b32.xlu1 %v319_v11, %s588_s23 }
 0x103   : > { %v322_v12 = vpop.permute.xlu1 %321  ;;  %v326_v13 = vpop.permute.xlu0 %325 }
 0x107   : > { %v324_v14 = vpop.permute.xlu1 %323  ;;  %v330_v18 = vpop.permute.xlu0 %329 }
 0x108   : > { %v337_v15 = vpack.c.bf16 %v324_v14, %v322_v12  ;;  %v339_v20 = vpack.c.bf16 %v330_v18, %v319_v11 }
 0x10a   : > { %537 = vmatpush3.bf16.msra.mxu0 %v337_v15 }
 0x10b   : > { %v328_v16 = vpop.permute.xlu1 %327  ;;  %538 = vmatprep.subr.bf16.mxu0 %v579_v6  ;;  %v334_v21 = vpop.permute.xlu0 %333 }
 0x10c   : > { %v338_v17 = vpack.c.bf16 %v328_v16, %v326_v13 }
 0x10e   : > { %539 = vmatpush3.bf16.msra.mxu0 %v338_v17 }
 0x10f   : > { %v332_v19 = vpop.permute.xlu1 %331  ;;  %540 = vmatprep.subr.bf16.mxu0 %v579_v6 }
 0x110   : > { %v340_v23 = vpack.c.bf16 %v334_v21, %v332_v19 }
 0x112   : > { %541 = vmatpush3.bf16.msra.mxu0 %v339_v20 }
 0x113   : > { %v336_v22 = vpop.permute.xlu1 %335  ;;  %542 = vmatprep.subr.bf16.mxu0 %v579_v6 }
 0x114   : > { %v341_v24 = vpack.c.bf16 %v336_v22, %v336_v22 }
 0x116   : > { %543 = vmatpush3.bf16.msra.mxu0 %v340_v23  ;;  %v349_v25 = vsel %vm347_vm1, %v341_v24, 0 }
 0x117   : > { %544 = vmatprep.subr.bf16.mxu0 %v579_v6 }
 0x11a   : > { %545 = vmatpush3.bf16.msra.mxu0 %v349_v25 }
 0x11d   : > { %547 = vmatmul.mubr.msk.bf16.vlgmr.msra.gmra.mrb[0].mxu0 %vm343_vm2, %v342_v26 }
 0x1f0   : > { %v385_v27 = vpop.f32.mrb[0].mxu0 }
 0x1f1   : > { %391 = vst [vmem:[%s286_s29] sm:$0xff] %v385_v27  ;;  %v548_v28 = vpop.f32.mrb[1].mxu0  ;;  %v392_v29 = vmul.f32 %v526_v9, %v385_v27 }
 0x1f2   : > { %v388_v30 = vpop.f32.mrb[2].mxu0 }
 0x1f3   : > { %393 = vadd.xlane.f32.xlu0 %v392_v29  ;;  %v549_v31 = vpop.f32.mrb[3].mxu0  ;;  %v395_v32 = vmul.f32 %v392_v29, %v392_v29 }
 0x1f5   : > { %396 = vadd.xlane.f32.xlu1 %v395_v32 }
 0x280   : > { %v394_v33 = vpop.xlane.xlu0 %393 }
 0x282   : > { %v397_v34 = vpop.xlane.xlu1 %396 }
 0x283   : > { %v399_v35 = vsel %vm398_vm3, %v394_v33, %v397_v34 }
 0x284   : > { %401 = vst.msk [vmem:[%s290_s10] sm:$0xff] %vm400_vm4, %v399_v35 }
 0x285 PF: > { %s18_s24 = sadd.s32 1, %s576_s24  }
 0x286   : > { %p15_p4 = scmp.ge.s32.totalorder %s18_s24, 4  }
 0x288   :  { %17 = sbr.rel (!%p15_p4) target bundleno = 1 (0x1), region = 94 }

// kernel: encoder_sh_forward.9
= control target key start
LH: loop header
LB: loop body
LE: loop exit
PB: predicated region body
PF: predicated region fallthrough
CT: control target
= control target key end

     0   :  { %s480_s15 = smov 0   ;;  %s514_s0 = inlined_call_operand.vmem [shape: f32[1,128], index: 0, kind: input, shape index: {}]   ;;  %s515_s1 = inlined_call_operand.vmem [shape: f32[2,4,128], index: 1, kind: input, shape index: {}]   ;;  %s516_s2 = inlined_call_operand.vmem [shape: bf16[8,36], index: 2, kind: input, shape index: {}]   ;;  %s517_s3 = inlined_call_operand.vmem [shape: f32[2,8,128], index: 3, kind: output, shape index: {0}]   ;;  %s518_s4 = inlined_call_operand.vmem [shape: f32[2,8,2], index: 4, kind: output, shape index: {1}]  }
   0x1 LB: > { %s393_s16 = sadd.s32 4294967295, %s443_s15   ;;  %p397_p0 = scmp.ge.s32.totalorder %s443_s15, 1  ;;  %s443_s15 = sphi %s480_s15, %s15_s15  }
   0x2   : > { %p164_p1 = scmp.lt.s32.totalorder %s443_s15, 3 }
   0x4   : > { %p165_p2 = pnand %p397_p0, %p164_p1 }
   0x5   : > { %p192_p3 = scmp.lt.s32.totalorder (!%p165_p2), %s393_s16, 1  ;;  %v445_v0 = vmov (!%p165_p2), 0.0   ;;  %s446_s21 = smov (!%p165_p2), 10   ;;  %vm450_vm0 = vmmov (!%p165_p2), 0   ;;  %vm235_vm1 = vcmask (!%p165_p2), 1043456   ;;  %vm248_vm2 = vcmask (!%p165_p2), 1041408  }
   0x6   : > { %168 = sbr.rel (%p165_p2) target bundleno = 514 (0x202), region = 32  ;;  %409 = vmatprep.subr.bf16.mxu0 (!%p165_p2), %v445_v0  ;;  %s447_s22 = smov (!%p165_p2), 11   ;;  %415 = vmatprep.mubr.msk.bf16.mxu0 (!%p165_p2), %vm450_vm0, %v445_v0  ;;  %v243_v22 = vld [vmem:[%s516_s2] sm:$0xf] (!%p165_p2)  ;;  %vm244_vm3 = vcmask (!%p165_p2), 293888   ;;  %vm305_vm4 = vcmask (!%p165_p2), 7168  }
   0x7   : > { %s448_s23 = smov (!%p165_p2), 1   ;;  %s449_s24 = smov (!%p165_p2), 9   ;;  %v402_v23 = vld [vmem:[%s514_s0] ss:$0 sm:$0xff] (!%p165_p2)  ;;  %vm307_vm5 = vcmask (!%p165_p2), 15360  }
   0x8   : > { %s451_s25 = smov (!%p165_p2), 127   ;;  %s452_s26 = smov (!%p165_p2), 118  }
   0x9   : > { %s453_s27 = smov (!%p165_p2), 119   ;;  %s454_s28 = smov (!%p165_p2), 117  }
   0xd   : > { %s520_s16 = smov (!%p192_p3, %s393_s16), 1 }
   0xe   : > { %s398_s17 = sshll.u32 %s520_s16, 2  ;;  %s399_s5 = sshll.u32 %s520_s16, 3 }
   0xf   : > { %s195_s20 = scalar_lea.vmem %s515_s1, %s398_s17  ;;  %s199_s8 = scalar_lea.vmem %s517_s3, %s399_s5 }
  0x10   : > { %v206_v1 = vld [vmem:[%s195_s20] sm:$0xf]  ;;  %s203_s13 = scalar_lea.vmem %s518_s4, %s399_s5 }
  0x11   : > { %209 = vrot.lane.b32.xlu0 %v206_v1, %s446_s21  ;;  %207 = vrot.lane.b32.xlu1 %v206_v1, %s447_s22 }
  0x15   : > { %213 = vrot.lane.b32.xlu0 %v206_v1, %s448_s23  ;;  %211 = vrot.lane.b32.xlu1 %v206_v1, %s449_s24 }
  0x19   : > { %215 = vrot.lane.b32.xlu0 %v206_v1, %s451_s25  ;;  %219 = vrot.lane.b32.xlu1 %v206_v1, %s452_s26 }
  0x1d   : > { %217 = vrot.lane.b32.xlu0 %v206_v1, %s453_s27  ;;  %221 = vrot.lane.b32.xlu1 %v206_v1, %s454_s28 }
  0x83   : > { %v210_v2 = vpop.permute.xlu0 %209  ;;  %v208_v3 = vpop.permute.xlu1 %207 }
  0x84   : > { %v224_v4 = vrot.slane %v210_v2, 4 }
  0x86   : > { %v236_v8 = vsel %vm235_vm1, %v208_v3, %v224_v4 }
  0x87   : > { %v214_v5 = vpop.permute.xlu0 %213  ;;  %v212_v6 = vpop.permute.xlu1 %211 }
  0x88   : > { %v227_v7 = vrot.slane %v214_v5, 4 }
  0x8a   : > { %v237_v9 = vsel %vm235_vm1, %v212_v6, %v227_v7 }
  0x8b   : > { %v216_v10 = vpop.permute.xlu0 %215  ;;  %v220_v11 = vpop.permute.xlu1 %219  ;;  %v240_v12 = vpack.c.bf16 %v237_v9, %v236_v8 }
  0x8c   : > { %v230_v13 = vrot.slane %v216_v10, 4  ;;  %v233_v14 = vrot.slane %v220_v11, 4 }
  0x8d   : > { %410 = vmatpush3.bf16.msra.mxu0 %v240_v12 }
  0x8e   : > { %411 = vmatprep.subr.bf16.mxu0 %v445_v0  ;;  %v238_v17 = vsel %vm235_vm1, %v206_v1, %v230_v13 }
  0x8f   : > { %v218_v15 = vpop.permute.xlu0 %217  ;;  %v222_v16 = vpop.permute.xlu1 %221 }
  0x90   : > { %v239_v18 = vsel %vm235_vm1, %v218_v15, %v233_v14  ;;  %v242_v19 = vpack.c.bf16 %v222_v16, %v222_v16 }
  0x91   : > { %v241_v20 = vpack.c.bf16 %v239_v18, %v238_v17 }
  0x92   : > { %v250_v21 = vsel %vm248_vm2, %v242_v19, 0 }
  0x93   : > { %412 = vmatpush3.bf16.msra.mxu0 %v241_v20 }
  0x94   : > { %413 = vmatprep.subr.bf16.mxu0 %v445_v0 }
  0x97   : > { %414 = vmatpush3.bf16.msra.mxu0 %v250_v21 }
  0x9a   : > { %416 = vmatmul.mubr.msk.bf16.vlgmr.msra.gmra.mrb[0].mxu0 %vm244_vm3, %v243_v22 }
 0x16d   : > { %v286_v24 = vpop.f32.mrb[0].mxu0 }
 0x16e   : > { %292 = vst [vmem:[%s199_s8] sm:$0xff] %v286_v24  ;;  %v417_v25 = vpop.f32.mrb[1].mxu0  ;;  %v299_v26 = vmul.f32 %v402_v23, %v286_v24 }
 0x16f   : > { %v289_v27 = vpop.f32.mrb[2].mxu0 }
 0x170   : > { %300 = vadd.xlane.f32.xlu0 %v299_v26  ;;  %v418_v28 = vpop.f32.mrb[3].mxu0  ;;  %v302_v29 = vmul.f32 %v299_v26, %v299_v26 }
 0x172   : > { %303 = vadd.xlane.f32.xlu1 %v302_v29 }
 0x1fd   : > { %v301_v30 = vpop.xlane.xlu0 %300 }
 0x1ff   : > { %v304_v31 = vpop.xlane.xlu1 %303 }
 0x200   : > { %v306_v32 = vsel %vm305_vm4, %v301_v30, %v304_v31 }
 0x201   : > { %308 = vst.msk [vmem:[%s203_s13] sm:$0xff] %vm307_vm5, %v306_v32 }
 0x202 PF: > { %s15_s15 = sadd.s32 1, %s443_s15  }
 0x203   : > { %p12_p4 = scmp.ge.s32.totalorder %s15_s15, 4  }
 0x205   :  { %14 = sbr.rel (!%p12_p4) target bundleno = 1 (0x1), region = 74 }

// kernel: encoder_sh_forward.11
= control target key start
LH: loop header
LB: loop body
LE: loop exit
PB: predicated region body
PF: predicated region fallthrough
CT: control target
= control target key end

     0   :  { %s920_s21 = smov 0   ;;  %s988_s0 = inlined_call_operand.vmem [shape: s32[1,16], index: 0, kind: input, shape index: {}]   ;;  %s989_s1 = inlined_call_operand.vmem [shape: f32[2,8,16], index: 1, kind: input, shape index: {}]   ;;  %s990_s2 = inlined_call_operand.vmem [shape: f32[2,8,16], index: 2, kind: input, shape index: {}]   ;;  %s991_s3 = inlined_call_operand.vmem [shape: f32[2,8,16], index: 3, kind: input, shape index: {}]   ;;  %s992_s4 = inlined_call_operand.vmem [shape: f32[2,8,16], index: 4, kind: input, shape index: {}]   ;;  %s993_s5 = inlined_call_operand.vmem [shape: f32[8,1], index: 5, kind: input, shape index: {}]   ;;  %s994_s6 = inlined_call_operand.vmem [shape: f32[8,1], index: 6, kind: input, shape index: {}]   ;;  %s995_s7 = inlined_call_operand.vmem [shape: f32[2,8,16], index: 7, kind: output, shape index: {0}]   ;;  %s996_s8 = inlined_call_operand.vmem [shape: f32[2,8,16], index: 8, kind: output, shape index: {1}]   ;;  %s997_s9 = inlined_call_operand.vmem [shape: f32[2,8,16], index: 9, kind: output, shape index: {2}]   ;;  %s998_s10 = inlined_call_operand.vmem [shape: f32[2,8,16], index: 10, kind: output, shape index: {3}]   ;;  %s999_s11 = inlined_call_operand.vmem [shape: f32[2,8,16], index: 11, kind: output, shape index: {4}]   ;;  %s1000_s12 = inlined_call_operand.vmem [shape: s32[2,8,16], index: 12, kind: output, shape index: {5}]  }
   0x1 LB: > { %s819_s22 = sadd.s32 4294967295, %s852_s21   ;;  %p823_p0 = scmp.ge.s32.totalorder %s852_s21, 1  ;;  %s852_s21 = sphi %s920_s21, %s23_s21  }
   0x2   : > { %p399_p1 = scmp.lt.s32.totalorder %s852_s21, 3 }
   0x4   : > { %p400_p2 = pnand %p823_p0, %p399_p1 }
   0x5   : > { %v511_v0 = vld [vmem:[%s993_s5] sm:$0xff] (!%p400_p2)  ;;  %v854_v1 = vmov (!%p400_p2), 0   ;;  %p471_p3 = scmp.lt.s32.totalorder (!%p400_p2), %s819_s22, 1  ;;  %v545_v3 = vlaneseq (!%p400_p2)  ;;  %vm528_vm0 = vcmask (!%p400_p2), 130048  }
   0x6   : > { %403 = sbr.rel (%p400_p2) target bundleno = 150 (0x96), region = 48  ;;  %845 = vset.pattern.permute.xlu0 (!%p400_p2), %v854_v1  ;;  %v512_v2 = vld [vmem:[%s994_s6] sm:$0xff] (!%p400_p2) }
   0x7   : > { %517 = vperm.xlu0 (!%p400_p2), %845, %v511_v0   ;;  %v546_v4 = vshrl.u32 (!%p400_p2), %v545_v3, 7  ;;  %v513_v5 = vld [vmem:[%s988_s0] sm:$0x1] (!%p400_p2) }
   0x8   : > { %v550_v12 = vadd.s32 (!%p400_p2), 1, %v513_v5  ;;  %v558_v17 = vadd.s32 (!%p400_p2), 8, %v513_v5  ;;  %v566_v25 = vadd.s32 (!%p400_p2), 9, %v513_v5 }
   0x9   : > { %v547_v11 = vsub.s32 (!%p400_p2), 0, %v546_v4 }
   0xb   : > { %523 = vperm.xlu0 (!%p400_p2), %845, %v512_v2   ;;  %v548_v23 = vrot.slane (!%p400_p2), %v513_v5, %v547_v11  ;;  %v554_v24 = vrot.slane (!%p400_p2), %v550_v12, %v547_v11  ;;  %v562_v30 = vrot.slane (!%p400_p2), %v558_v17, %v547_v11  ;;  %v570_v31 = vrot.slane (!%p400_p2), %v566_v25, %v547_v11 }
   0xd   : > { %s1002_s22 = smov (!%p471_p3, %s819_s22), 1 }
   0xe   : > { %s934_s27 = sshll.u32 %s1002_s22, 3 }
   0xf   : > { %s474_s30 = scalar_lea.vmem %s989_s1, %s934_s27  ;;  %s478_s15 = scalar_lea.vmem %s990_s2, %s934_s27 }
  0x10   : > { %s482_s18 = scalar_lea.vmem %s991_s3, %s934_s27  ;;  %s486_s22 = scalar_lea.vmem %s992_s4, %s934_s27  ;;  %v514_v6 = vld [vmem:[%s474_s30] sm:$0xff] }
  0x11   : > { %v530_v8 = vld [vmem:[%s478_s15] sm:$0xff]  ;;  %s490_s28 = scalar_lea.vmem %s995_s7, %s934_s27  ;;  %s494_s13 = scalar_lea.vmem %s996_s8, %s934_s27 }
  0x12   : > { %v535_v9 = vld [vmem:[%s482_s18] sm:$0xff]  ;;  %s498_s16 = scalar_lea.vmem %s997_s9, %s934_s27  ;;  %s502_s19 = scalar_lea.vmem %s998_s10, %s934_s27 }
  0x13   : > { %v540_v10 = vld [vmem:[%s486_s22] sm:$0xff]  ;;  %s506_s23 = scalar_lea.vmem %s999_s11, %s934_s27  ;;  %s510_s26 = scalar_lea.vmem %s1000_s12, %s934_s27 }
  0x86   : > { %v518_v7 = vpop.permute.xlu0 %517 }
  0x87   : > { %v520_v13 = vmul.f32 %v518_v7, %v514_v6  ;;  %v531_v14 = vmul.f32 %v530_v8, %v518_v7  ;;  %v536_v15 = vmul.f32 %v535_v9, %v518_v7  ;;  %v541_v16 = vmul.f32 %v540_v10, %v518_v7 }
  0x8a   : > { %v524_v18 = vpop.permute.xlu0 %523 }
  0x8b   : > { %v526_v19 = vadd.f32 %v524_v18, %v520_v13  ;;  %v532_v20 = vadd.f32 %v531_v14, %v524_v18  ;;  %v537_v21 = vadd.f32 %v536_v15, %v524_v18  ;;  %v542_v22 = vadd.f32 %v541_v16, %v524_v18 }
  0x8d   : > { %v527_v26 = vmax.f32 %v526_v19, 0.0  ;;  %v533_v27 = vmax.f32 %v532_v20, 0.0  ;;  %v538_v28 = vmax.f32 %v537_v21, 0.0  ;;  %v543_v29 = vmax.f32 %v542_v22, 0.0 }
  0x8f   : > { %529 = vst.msk [vmem:[%s490_s28] sm:$0xff] %vm528_vm0, %v527_v26  ;;  %534 = vst.msk [vmem:[%s494_s13] sm:$0xff] %vm528_vm0, %v533_v27  ;;  %vm549_vm1 = vcmp.gt.f32.partialorder %v533_v27, %v527_v26 }
  0x90   : > { %539 = vst.msk [vmem:[%s498_s16] sm:$0xff] %vm528_vm0, %v538_v28  ;;  %544 = vst.msk [vmem:[%s502_s19] sm:$0xff] %vm528_vm0, %v543_v29  ;;  %v555_v32 = vsel %vm549_vm1, %v554_v24, %v548_v23  ;;  %v556_v33 = vsel %vm549_vm1, %v533_v27, %v527_v26 }
  0x91   : > { %vm557_vm2 = vcmp.gt.f32.partialorder %v538_v28, %v556_v33 }
  0x92   : > { %v563_v34 = vsel %vm557_vm2, %v562_v30, %v555_v32  ;;  %v564_v35 = vsel %vm557_vm2, %v538_v28, %v556_v33 }
  0x93   : > { %vm565_vm3 = vcmp.gt.f32.partialorder %v543_v29, %v564_v35 }
  0x94   : > { %v571_v36 = vsel %vm565_vm3, %v570_v31, %v563_v34  ;;  %v572_v37 = vsel %vm565_vm3, %v543_v29, %v564_v35 }
  0x95   : > { %573 = vst.msk [vmem:[%s506_s23] sm:$0xff] %vm528_vm0, %v572_v37  ;;  %574 = vst.msk [vmem:[%s510_s26] sm:$0xff] %vm528_vm0, %v571_v36 }
  0x96 PF: > { %s23_s21 = sadd.s32 1, %s852_s21  }
  0x97   : > { %p20_p4 = scmp.ge.s32.totalorder %s23_s21, 4  }
  0x99   :  { %22 = sbr.rel (!%p20_p4) target bundleno = 1 (0x1), region = 147 }

</bundles_post_ra>
